<compile_context>
chip_gen: v7x
topology: tpu7x:2x2x1
jax: 0.10.0
libtpu: 0.0.40
codegen_flags: <defaults>
</compile_context>

<pallas_src>
import functools

import jax
import jax.numpy as jnp
from jax import lax
from jax.experimental import pallas as pl
from jax.experimental.pallas import tpu as pltpu


def _round_up(x, m):
    return ((x + m - 1) // m) * m


# ---------------------------------------------------------------------------
# Pallas kernel
# ---------------------------------------------------------------------------
def posterior_encoder_kernel(
        lengths_ref,                                   # scalar prefetch (SMEM)
        x_ref, noise_ref,                              # per-batch activations
        pre_w_ref, pre_b_ref,
        in_w_t_ref, in_w_s_ref, in_b_t_ref, in_b_s_ref,
        rsw_res_ref, rsw_skip_ref, rsb_res_ref, rsb_skip_ref,
        proj_wm_ref, proj_bm_ref, proj_ws_ref, proj_bs_ref,
        out_ref,                                       # (1, 3, L, Co): z/m/logs
        hbuf_ref,                                      # persistent padded taps
        *, n_layers, kernel_size, dilation_rate, hidden,
        pad_off, compute_dtype):
    L = x_ref.shape[1]
    b = pl.program_id(0)

    # Length mask built in-kernel (no lane-width-1 DMA); the (L, hidden)
    # broadcast is hoisted once and reused by every layer.
    length = lengths_ref[b]
    t_idx = lax.broadcasted_iota(jnp.int32, (L, 1), 0)
    mask_h = jnp.broadcast_to((t_idx < length).astype(jnp.float32), (L, hidden))

    # Zero the padded tap buffer ONCE; halo rows outside [pad_off, pad_off+L)
    # are never written again, so they stay zero for every layer / dilation.
    hbuf_ref[...] = jnp.zeros_like(hbuf_ref)

    # pre_conv: Conv1d(kernel_size=1) == matmul over the channel dim.
    # x_ref is already bf16 (cast in wrapper) -> no f32 activation DMA.
    h = (jnp.dot(x_ref[0], pre_w_ref[...],
                 preferred_element_type=jnp.float32) + pre_b_ref[...])
    h = h * mask_h

    output = jnp.zeros((L, hidden), jnp.float32)

    # WN: stack of gated dilated conv layers (g is None -> no cond layer).
    for i in range(n_layers):
        d = dilation_rate ** i
        pad = d * (kernel_size - 1) // 2

        # Write (masked) h into the center of the persistent padded buffer;
        # the k taps are then plain static sublane slices (no concat / copy).
        hbuf_ref[pad_off:pad_off + L, :] = h

        # k tap matmuls accumulated in f32 (tanh / sigmoid halves separately,
        # so no mid-lane slicing of the 2H result).
        tap0 = hbuf_ref[pad_off - pad:pad_off - pad + L, :].astype(compute_dtype)
        x_t = (jnp.dot(tap0, in_w_t_ref[i, 0],
                       preferred_element_type=jnp.float32) + in_b_t_ref[i])
        x_s = (jnp.dot(tap0, in_w_s_ref[i, 0],
                       preferred_element_type=jnp.float32) + in_b_s_ref[i])
        for j in range(1, kernel_size):
            start = pad_off - pad + j * d
            tap = hbuf_ref[start:start + L, :].astype(compute_dtype)
            x_t = x_t + jnp.dot(tap, in_w_t_ref[i, j],
                                preferred_element_type=jnp.float32)
            x_s = x_s + jnp.dot(tap, in_w_s_ref[i, j],
                                preferred_element_type=jnp.float32)

        acts = (jnp.tanh(x_t) * jax.nn.sigmoid(x_s)).astype(compute_dtype)

        # res / skip halves also via separate lane-contiguous matmuls.
        skip = (jnp.dot(acts, rsw_skip_ref[i],
                        preferred_element_type=jnp.float32) + rsb_skip_ref[i])
        output = output + skip
        if i < n_layers - 1:
            res = (jnp.dot(acts, rsw_res_ref[i],
                           preferred_element_type=jnp.float32) + rsb_res_ref[i])
            h = (h + res) * mask_h

    # WN masks its output and PosteriorEncoder masks again; mask is 0/1 so a
    # single multiply is exactly equivalent.
    output = (output * mask_h).astype(compute_dtype)

    # proj: Conv1d(kernel_size=1); m / logs via separate matmuls.
    # Note: the reference PyTorch module does NOT mask stats or z -> neither do we.
    m = (jnp.dot(output, proj_wm_ref[...],
                 preferred_element_type=jnp.float32) + proj_bm_ref[...])
    logs = (jnp.dot(output, proj_ws_ref[...],
                    preferred_element_type=jnp.float32) + proj_bs_ref[...])
    z = m + noise_ref[0] * jnp.exp(logs)

    # Un-packed, unpermuted stores (no lane concat at offsets Co / 2*Co).
    out_ref[0, 0] = z
    out_ref[0, 1] = m
    out_ref[0, 2] = logs


# ---------------------------------------------------------------------------
# Wrapper
# ---------------------------------------------------------------------------
def _preprocess_params(params, *, n_layers, hidden, out_channels, compute_dtype):
    H, Co = hidden, out_channels
    cd, f32 = compute_dtype, jnp.float32

    in_w = params["in_w"]          # (n_layers, k, H, 2H)
    in_b = params["in_b"]          # (n_layers, 1, 2H)
    rsw, rsb = params["rsw"], params["rsb"]

    if n_layers > 1:
        rsw_skip = jnp.concatenate([rsw[:-1, :, H:], rsw[-1:, :, :H]], axis=0)
        rsb_skip = jnp.concatenate([rsb[:-1, :, H:], rsb[-1:, :, :H]], axis=0)
    else:   # single layer: res_skip conv is skip-only (hidden -> hidden)
        rsw_skip = rsw[:, :, :H]
        rsb_skip = rsb[:, :, :H]

    return {
        "pre_w": params["pre_w"].astype(cd),
        "pre_b": params["pre_b"].astype(f32),
        "in_w_t": in_w[..., :H].astype(cd),
        "in_w_s": in_w[..., H:].astype(cd),
        "in_b_t": in_b[..., :H].astype(f32),
        "in_b_s": in_b[..., H:].astype(f32),
        "rsw_res": rsw[:, :, :H].astype(cd),     # last-layer row never read
        "rsw_skip": rsw_skip.astype(cd),
        "rsb_res": rsb[:, :, :H].astype(f32),
        "rsb_skip": rsb_skip.astype(f32),
        "proj_wm": params["proj_w"][:, :Co].astype(cd),
        "proj_ws": params["proj_w"][:, Co:].astype(cd),
        "proj_bm": params["proj_b"][:, :Co].astype(f32),
        "proj_bs": params["proj_b"][:, Co:].astype(f32),
    }


def posterior_encoder(x_ncl, lengths, noise_ncl, params, *,
                      n_layers, kernel_size, dilation_rate,
                      hidden_channels, out_channels,
                      compute_dtype=jnp.bfloat16):
    B, n_mel, L = x_ncl.shape
    H, Co, k = hidden_channels, out_channels, kernel_size

    # NCL -> (B, L, C); x goes over HBM as bf16 (first kernel op is a bf16 dot).
    x = jnp.transpose(x_ncl, (0, 2, 1)).astype(compute_dtype)
    noise = jnp.transpose(noise_ncl, (0, 2, 1)).astype(jnp.float32)
    lengths = lengths.astype(jnp.int32)

    p = _preprocess_params(params, n_layers=n_layers, hidden=H,
                           out_channels=Co, compute_dtype=compute_dtype)
    weight_order = ["pre_w", "pre_b", "in_w_t", "in_w_s", "in_b_t", "in_b_s",
                    "rsw_res", "rsw_skip", "rsb_res", "rsb_skip",
                    "proj_wm", "proj_bm", "proj_ws", "proj_bs"]
    weights = [p[n] for n in weight_order]

    # Persistent padded tap buffer: center at a sublane-aligned offset, halos
    # big enough for the largest dilation, total rounded to 8 sublanes.
    max_pad = (dilation_rate ** (n_layers - 1)) * (kernel_size - 1) // 2
    pad_off = _round_up(max_pad, 8) if max_pad > 0 else 0
    l_buf = _round_up(pad_off + L + max_pad, 8)

    kernel = functools.partial(
        posterior_encoder_kernel,
        n_layers=n_layers, kernel_size=k, dilation_rate=dilation_rate,
        hidden=H, pad_off=pad_off, compute_dtype=compute_dtype)

    def full(a):
        nd = a.ndim
        return pl.BlockSpec(a.shape, lambda b, lens, nd=nd: (0,) * nd)

    def per_b(shape):
        n = len(shape)
        return pl.BlockSpec((1,) + shape, lambda b, lens, n=n: (b,) + (0,) * n)

    # Advisory cost estimate for the XLA scheduler.
    flops_per_b = (2 * L * n_mel * H
                   + n_layers * (2 * L * H * H * 2 * k + 2 * L * H * H * 2)
                   + 2 * L * H * 2 * Co)
    transc_per_b = n_layers * 2 * L * H + L * Co
    weight_bytes = sum(int(w.size) * w.dtype.itemsize for w in weights)
    bytes_accessed = int(x.size * x.dtype.itemsize + noise.size * 4
                         + B * 3 * L * Co * 4 + weight_bytes + lengths.size * 4)
    cost = pl.CostEstimate(flops=int(B * flops_per_b),
                           transcendentals=int(B * transc_per_b),
                           bytes_accessed=bytes_accessed)

    out = pl.pallas_call(
        kernel,
        out_shape=jax.ShapeDtypeStruct((B, 3, L, Co), jnp.float32),
        grid_spec=pltpu.PrefetchScalarGridSpec(
            num_scalar_prefetch=1,
            grid=(B,),
            in_specs=[per_b((L, n_mel)),            # x (bf16)
                      per_b((L, Co)),               # noise (f32)
                      ] + [full(w) for w in weights],
            out_specs=pl.BlockSpec((1, 3, L, Co), lambda b, lens: (b, 0, 0, 0)),
            scratch_shapes=[pltpu.VMEM((l_buf, H), jnp.float32)]),
        compiler_params=pltpu.CompilerParams(
            dimension_semantics=("parallel",),
            vmem_limit_bytes=64 * 1024 * 1024),
        cost_estimate=cost,
    )(lengths, x, noise, *weights)

    # One transpose of the (z, m, logs) slab, then split along the slot axis.
    out_ncl = jnp.transpose(out, (0, 1, 3, 2))        # (B, 3, Co, L)
    return out_ncl[:, 0], out_ncl[:, 1], out_ncl[:, 2]


# ---------------------------------------------------------------------------
# Pure-JAX reference (same math; matmul inputs cast to the same compute dtype)
# ---------------------------------------------------------------------------
def reference(x_ncl, mask_n1l, noise_ncl, p, *, n_layers, kernel_size,
              dilation_rate, hidden_channels, out_channels,
              compute_dtype=jnp.bfloat16):
    cd = compute_dtype
    mm = lambda a, w: jnp.einsum("blc,co->blo", a.astype(cd), w.astype(cd),
                                 preferred_element_type=jnp.float32)
    x = jnp.transpose(x_ncl, (0, 2, 1)).astype(jnp.float32)
    mask = jnp.transpose(mask_n1l, (0, 2, 1)).astype(jnp.float32)
    noise = jnp.transpose(noise_ncl, (0, 2, 1)).astype(jnp.float32)
    B, L, _ = x.shape
    H = hidden_channels

    h = (mm(x, p["pre_w"]) + p["pre_b"]) * mask
    output = jnp.zeros((B, L, H), jnp.float32)
    for i in range(n_layers):
        d = dilation_rate ** i
        pad = d * (kernel_size - 1) // 2
        hp = jnp.pad(h, ((0, 0), (pad, pad), (0, 0)))
        x_in = jnp.broadcast_to(p["in_b"][i], (B, L, 2 * H)).astype(jnp.float32)
        for j in range(kernel_size):
            shifted = hp[:, j * d: j * d + L, :]
            x_in = x_in + mm(shifted, p["in_w"][i, j])
        acts = jnp.tanh(x_in[:, :, :H]) * jax.nn.sigmoid(x_in[:, :, H:])
        if i < n_layers - 1:
            rs = mm(acts, p["rsw"][i]) + p["rsb"][i]
            h = (h + rs[:, :, :H]) * mask
            output = output + rs[:, :, H:]
        else:
            rs = mm(acts, p["rsw"][i, :, :H]) + p["rsb"][i, :, :H]
            output = output + rs
    output = output * mask                     # mask is 0/1: one multiply
    m = mm(output, p["proj_w"][:, :out_channels]) + p["proj_b"][:, :out_channels]
    logs = mm(output, p["proj_w"][:, out_channels:]) + p["proj_b"][:, out_channels:]
    z = m + noise * jnp.exp(logs)
    t = lambda a: jnp.transpose(a, (0, 2, 1))
    return t(z), t(m), t(logs)


# ---------------------------------------------------------------------------
# Driver
# ---------------------------------------------------------------------------
if __name__ == "__main__":
    B = 2
    n_mel_channels = 8
    hidden_channels = 32
    out_channels = 16
    n_layers = 2
    kernel_size = 3
    dilation_rate = 2
    L = 16

    key = jax.random.PRNGKey(0)
    ks = jax.random.split(key, 10)
    params = {
        # pre_conv: Conv1d(n_mel, hidden, k=1) -> (in, out) matrix + bias
        "pre_w": 0.3 * jax.random.normal(ks[0], (n_mel_channels, hidden_channels), jnp.float32),
        "pre_b": 0.1 * jax.random.normal(ks[1], (1, hidden_channels), jnp.float32),
        # WN in_layers[i]: Conv1d(hidden, 2*hidden, k, dilation=dr**i)
        "in_w": 0.2 * jax.random.normal(ks[2], (n_layers, kernel_size, hidden_channels, 2 * hidden_channels), jnp.float32),
        "in_b": 0.1 * jax.random.normal(ks[3], (n_layers, 1, 2 * hidden_channels), jnp.float32),
        # WN res_skip_layers[i]: Conv1d(hidden, 2*hidden (hidden for last), k=1)
        "rsw": 0.2 * jax.random.normal(ks[4], (n_layers, hidden_channels, 2 * hidden_channels), jnp.float32),
        "rsb": 0.1 * jax.random.normal(ks[5], (n_layers, 1, 2 * hidden_channels), jnp.float32),
        # proj: Conv1d(hidden, 2*out, k=1)
        "proj_w": 0.2 * jax.random.normal(ks[6], (hidden_channels, 2 * out_channels), jnp.float32),
        "proj_b": 0.1 * jax.random.normal(ks[7], (1, 2 * out_channels), jnp.float32),
    }

    x = jax.random.normal(ks[8], (B, n_mel_channels, L), jnp.float32)       # NCL
    noise = jax.random.normal(ks[9], (B, out_channels, L), jnp.float32)     # torch.randn equivalent
    lengths = jnp.array([L, L - 4], jnp.int32)
    mask = (jnp.arange(L)[None, None, :] < lengths[:, None, None]).astype(jnp.float32)  # (B,1,L)

    hp = dict(n_layers=n_layers, kernel_size=kernel_size,
              dilation_rate=dilation_rate, hidden_channels=hidden_channels,
              out_channels=out_channels)

    z, m, logs = posterior_encoder(x, lengths, noise, params, **hp)
    jax.block_until_ready((z, m, logs))

    zr, mr, lr = reference(x, mask, noise, params, **hp)
    assert z.shape == (B, out_channels, L) and m.shape == z.shape and logs.shape == z.shape
    # bf16 MXU inputs in both kernel and reference; remaining diffs are f32
    # accumulation-order / double-rounding noise -> loose-but-diagnostic tol.
    tol = dict(atol=1e-2, rtol=1e-2)
    assert jnp.allclose(z, zr, **tol), float(jnp.max(jnp.abs(z - zr)))
    assert jnp.allclose(m, mr, **tol), float(jnp.max(jnp.abs(m - mr)))
    assert jnp.allclose(logs, lr, **tol), float(jnp.max(jnp.abs(logs - lr)))

    print("KERNEL_OK")
</pallas_src>

<mosaic_0001>
module attributes {stable_mosaic.version = 11 : i64} {
  func.func @posterior_encoder_kernel(%arg0: i32, %arg1: memref<2xi32, #tpu.memory_space<smem>>, %arg2: memref<1x16x8xbf16, #tpu.memory_space<vmem>>, %arg3: memref<1x16x16xf32, #tpu.memory_space<vmem>>, %arg4: memref<8x32xbf16, #tpu.memory_space<vmem>>, %arg5: memref<1x32xf32, #tpu.memory_space<vmem>>, %arg6: memref<2x3x32x32xbf16, #tpu.memory_space<vmem>>, %arg7: memref<2x3x32x32xbf16, #tpu.memory_space<vmem>>, %arg8: memref<2x1x32xf32, #tpu.memory_space<vmem>>, %arg9: memref<2x1x32xf32, #tpu.memory_space<vmem>>, %arg10: memref<2x32x32xbf16, #tpu.memory_space<vmem>>, %arg11: memref<2x32x32xbf16, #tpu.memory_space<vmem>>, %arg12: memref<2x1x32xf32, #tpu.memory_space<vmem>>, %arg13: memref<2x1x32xf32, #tpu.memory_space<vmem>>, %arg14: memref<32x16xbf16, #tpu.memory_space<vmem>>, %arg15: memref<1x16xf32, #tpu.memory_space<vmem>>, %arg16: memref<32x16xbf16, #tpu.memory_space<vmem>>, %arg17: memref<1x16xf32, #tpu.memory_space<vmem>>, %arg18: memref<1x3x16x16xf32, #tpu.memory_space<vmem>>, %arg19: memref<32x32xf32, #tpu.memory_space<vmem>>) attributes {dimension_semantics = [#tpu.dimension_semantics<parallel>], iteration_bounds = array<i64: 2>, scalar_prefetch = 1 : i64, scratch_operands = 1 : i64, tpu.core_type = #tpu.core_type<tc>, window_params = [{transform_indices = @transform_0, window_bounds = array<i64: 1, 16, 8>}, {transform_indices = @transform_1, window_bounds = array<i64: 1, 16, 16>}, {pipeline_mode = #tpu.pipeline_mode<synchronous>, transform_indices = @transform_2, window_bounds = array<i64: 8, 32>}, {pipeline_mode = #tpu.pipeline_mode<synchronous>, transform_indices = @transform_3, window_bounds = array<i64: 1, 32>}, {pipeline_mode = #tpu.pipeline_mode<synchronous>, transform_indices = @transform_4, window_bounds = array<i64: 2, 3, 32, 32>}, {pipeline_mode = #tpu.pipeline_mode<synchronous>, transform_indices = @transform_5, window_bounds = array<i64: 2, 3, 32, 32>}, {pipeline_mode = #tpu.pipeline_mode<synchronous>, transform_indices = @transform_6, window_bounds = array<i64: 2, 1, 32>}, {pipeline_mode = #tpu.pipeline_mode<synchronous>, transform_indices = @transform_7, window_bounds = array<i64: 2, 1, 32>}, {pipeline_mode = #tpu.pipeline_mode<synchronous>, transform_indices = @transform_8, window_bounds = array<i64: 2, 32, 32>}, {pipeline_mode = #tpu.pipeline_mode<synchronous>, transform_indices = @transform_9, window_bounds = array<i64: 2, 32, 32>}, {pipeline_mode = #tpu.pipeline_mode<synchronous>, transform_indices = @transform_10, window_bounds = array<i64: 2, 1, 32>}, {pipeline_mode = #tpu.pipeline_mode<synchronous>, transform_indices = @transform_11, window_bounds = array<i64: 2, 1, 32>}, {pipeline_mode = #tpu.pipeline_mode<synchronous>, transform_indices = @transform_12, window_bounds = array<i64: 32, 16>}, {pipeline_mode = #tpu.pipeline_mode<synchronous>, transform_indices = @transform_13, window_bounds = array<i64: 1, 16>}, {pipeline_mode = #tpu.pipeline_mode<synchronous>, transform_indices = @transform_14, window_bounds = array<i64: 32, 16>}, {pipeline_mode = #tpu.pipeline_mode<synchronous>, transform_indices = @transform_15, window_bounds = array<i64: 1, 16>}, {transform_indices = @transform_16, window_bounds = array<i64: 1, 3, 16, 16>}]} {
    %0 = arith.index_cast %arg0 : i32 to index
    %1 = memref.load %arg1[%0] : memref<2xi32, #tpu.memory_space<smem>>
    %2 = tpu.iota {dimensions = array<i32: 0>} : vector<16x1xi32>
    %3 = vector.broadcast %1 : i32 to vector<16x1xi32>
    %4 = arith.cmpi slt, %2, %3 : vector<16x1xi32>
    %5 = arith.extui %4 : vector<16x1xi1> to vector<16x1xi32>
    %6 = arith.sitofp %5 : vector<16x1xi32> to vector<16x1xf32>
    %7 = vector.shape_cast %6 : vector<16x1xf32> to vector<16x1xf32>
    %8 = vector.broadcast %7 : vector<16x1xf32> to vector<16x32xf32>
    %cst = arith.constant 0.000000e+00 : f32
    %9 = vector.broadcast %cst : f32 to vector<32x32xf32>
    %c0 = arith.constant 0 : index
    %c0_0 = arith.constant 0 : index
    %10 = vector.load %arg19[%c0, %c0_0] : memref<32x32xf32, #tpu.memory_space<vmem>>, vector<32x32xf32>
    tpu.vector_store %arg19[%c0, %c0_0], %9 {strides = array<i32>} : memref<32x32xf32, #tpu.memory_space<vmem>>, vector<32x32xf32>,
    %c0_1 = arith.constant 0 : index
    %c0_2 = arith.constant 0 : index
    %c0_3 = arith.constant 0 : index
    %11 = vector.load %arg2[%c0_1, %c0_2, %c0_3] : memref<1x16x8xbf16, #tpu.memory_space<vmem>>, vector<1x16x8xbf16>
    %12 = vector.shape_cast %11 : vector<1x16x8xbf16> to vector<16x8xbf16>
    %c0_4 = arith.constant 0 : index
    %c0_5 = arith.constant 0 : index
    %13 = vector.load %arg4[%c0_4, %c0_5] : memref<8x32xbf16, #tpu.memory_space<vmem>>, vector<8x32xbf16>
    %cst_6 = arith.constant dense<0.000000e+00> : vector<16x32xf32>
    %14 = tpu.matmul %12, %13, %cst_6 {dimension_numbers = #tpu.dot_dimension_numbers<[1], [0], [0], [1], [0, 0, 1, 1], [], []>} : vector<16x8xbf16>, vector<8x32xbf16>, vector<16x32xf32> -> vector<16x32xf32>
    %c0_7 = arith.constant 0 : index
    %c0_8 = arith.constant 0 : index
    %15 = vector.load %arg5[%c0_7, %c0_8] : memref<1x32xf32, #tpu.memory_space<vmem>>, vector<1x32xf32>
    %16 = vector.broadcast %15 : vector<1x32xf32> to vector<16x32xf32>
    %17 = arith.addf %14, %16 : vector<16x32xf32>
    %18 = arith.mulf %17, %8 : vector<16x32xf32>
    %cst_9 = arith.constant 0.000000e+00 : f32
    %19 = vector.broadcast %cst_9 : f32 to vector<16x32xf32>
    %c8 = arith.constant 8 : index
    %c0_10 = arith.constant 0 : index
    %20 = vector.load %arg19[%c8, %c0_10] : memref<32x32xf32, #tpu.memory_space<vmem>>, vector<16x32xf32>
    tpu.vector_store %arg19[%c8, %c0_10], %18 {strides = array<i32>} : memref<32x32xf32, #tpu.memory_space<vmem>>, vector<16x32xf32>,
    %c7 = arith.constant 7 : index
    %c0_11 = arith.constant 0 : index
    %21 = vector.load %arg19[%c7, %c0_11] : memref<32x32xf32, #tpu.memory_space<vmem>>, vector<16x32xf32>
    %22 = arith.truncf %21 : vector<16x32xf32> to vector<16x32xbf16>
    %c0_12 = arith.constant 0 : index
    %c0_13 = arith.constant 0 : index
    %c0_14 = arith.constant 0 : index
    %c0_15 = arith.constant 0 : index
    %23 = vector.load %arg6[%c0_12, %c0_13, %c0_14, %c0_15] : memref<2x3x32x32xbf16, #tpu.memory_space<vmem>>, vector<1x1x32x32xbf16>
    %24 = vector.shape_cast %23 : vector<1x1x32x32xbf16> to vector<32x32xbf16>
    %cst_16 = arith.constant dense<0.000000e+00> : vector<16x32xf32>
    %25 = tpu.matmul %22, %24, %cst_16 {dimension_numbers = #tpu.dot_dimension_numbers<[1], [0], [0], [1], [0, 0, 1, 1], [], []>} : vector<16x32xbf16>, vector<32x32xbf16>, vector<16x32xf32> -> vector<16x32xf32>
    %c0_17 = arith.constant 0 : index
    %c0_18 = arith.constant 0 : index
    %c0_19 = arith.constant 0 : index
    %26 = vector.load %arg8[%c0_17, %c0_18, %c0_19] : memref<2x1x32xf32, #tpu.memory_space<vmem>>, vector<1x1x32xf32>
    %27 = vector.shape_cast %26 : vector<1x1x32xf32> to vector<1x32xf32>
    %28 = vector.broadcast %27 : vector<1x32xf32> to vector<16x32xf32>
    %29 = arith.addf %25, %28 : vector<16x32xf32>
    %c0_20 = arith.constant 0 : index
    %c0_21 = arith.constant 0 : index
    %c0_22 = arith.constant 0 : index
    %c0_23 = arith.constant 0 : index
    %30 = vector.load %arg7[%c0_20, %c0_21, %c0_22, %c0_23] : memref<2x3x32x32xbf16, #tpu.memory_space<vmem>>, vector<1x1x32x32xbf16>
    %31 = vector.shape_cast %30 : vector<1x1x32x32xbf16> to vector<32x32xbf16>
    %cst_24 = arith.constant dense<0.000000e+00> : vector<16x32xf32>
    %32 = tpu.matmul %22, %31, %cst_24 {dimension_numbers = #tpu.dot_dimension_numbers<[1], [0], [0], [1], [0, 0, 1, 1], [], []>} : vector<16x32xbf16>, vector<32x32xbf16>, vector<16x32xf32> -> vector<16x32xf32>
    %c0_25 = arith.constant 0 : index
    %c0_26 = arith.constant 0 : index
    %c0_27 = arith.constant 0 : index
    %33 = vector.load %arg9[%c0_25, %c0_26, %c0_27] : memref<2x1x32xf32, #tpu.memory_space<vmem>>, vector<1x1x32xf32>
    %34 = vector.shape_cast %33 : vector<1x1x32xf32> to vector<1x32xf32>
    %35 = vector.broadcast %34 : vector<1x32xf32> to vector<16x32xf32>
    %36 = arith.addf %32, %35 : vector<16x32xf32>
    %c8_28 = arith.constant 8 : index
    %c0_29 = arith.constant 0 : index
    %37 = vector.load %arg19[%c8_28, %c0_29] : memref<32x32xf32, #tpu.memory_space<vmem>>, vector<16x32xf32>
    %38 = arith.truncf %37 : vector<16x32xf32> to vector<16x32xbf16>
    %c0_30 = arith.constant 0 : index
    %c1 = arith.constant 1 : index
    %c0_31 = arith.constant 0 : index
    %c0_32 = arith.constant 0 : index
    %39 = vector.load %arg6[%c0_30, %c1, %c0_31, %c0_32] : memref<2x3x32x32xbf16, #tpu.memory_space<vmem>>, vector<1x1x32x32xbf16>
    %40 = vector.shape_cast %39 : vector<1x1x32x32xbf16> to vector<32x32xbf16>
    %cst_33 = arith.constant dense<0.000000e+00> : vector<16x32xf32>
    %41 = tpu.matmul %38, %40, %cst_33 {dimension_numbers = #tpu.dot_dimension_numbers<[1], [0], [0], [1], [0, 0, 1, 1], [], []>} : vector<16x32xbf16>, vector<32x32xbf16>, vector<16x32xf32> -> vector<16x32xf32>
    %42 = arith.addf %29, %41 : vector<16x32xf32>
    %c0_34 = arith.constant 0 : index
    %c1_35 = arith.constant 1 : index
    %c0_36 = arith.constant 0 : index
    %c0_37 = arith.constant 0 : index
    %43 = vector.load %arg7[%c0_34, %c1_35, %c0_36, %c0_37] : memref<2x3x32x32xbf16, #tpu.memory_space<vmem>>, vector<1x1x32x32xbf16>
    %44 = vector.shape_cast %43 : vector<1x1x32x32xbf16> to vector<32x32xbf16>
    %cst_38 = arith.constant dense<0.000000e+00> : vector<16x32xf32>
    %45 = tpu.matmul %38, %44, %cst_38 {dimension_numbers = #tpu.dot_dimension_numbers<[1], [0], [0], [1], [0, 0, 1, 1], [], []>} : vector<16x32xbf16>, vector<32x32xbf16>, vector<16x32xf32> -> vector<16x32xf32>
    %46 = arith.addf %36, %45 : vector<16x32xf32>
    %c9 = arith.constant 9 : index
    %c0_39 = arith.constant 0 : index
    %47 = vector.load %arg19[%c9, %c0_39] : memref<32x32xf32, #tpu.memory_space<vmem>>, vector<16x32xf32>
    %48 = arith.truncf %47 : vector<16x32xf32> to vector<16x32xbf16>
    %c0_40 = arith.constant 0 : index
    %c2 = arith.constant 2 : index
    %c0_41 = arith.constant 0 : index
    %c0_42 = arith.constant 0 : index
    %49 = vector.load %arg6[%c0_40, %c2, %c0_41, %c0_42] : memref<2x3x32x32xbf16, #tpu.memory_space<vmem>>, vector<1x1x32x32xbf16>
    %50 = vector.shape_cast %49 : vector<1x1x32x32xbf16> to vector<32x32xbf16>
    %cst_43 = arith.constant dense<0.000000e+00> : vector<16x32xf32>
    %51 = tpu.matmul %48, %50, %cst_43 {dimension_numbers = #tpu.dot_dimension_numbers<[1], [0], [0], [1], [0, 0, 1, 1], [], []>} : vector<16x32xbf16>, vector<32x32xbf16>, vector<16x32xf32> -> vector<16x32xf32>
    %52 = arith.addf %42, %51 : vector<16x32xf32>
    %c0_44 = arith.constant 0 : index
    %c2_45 = arith.constant 2 : index
    %c0_46 = arith.constant 0 : index
    %c0_47 = arith.constant 0 : index
    %53 = vector.load %arg7[%c0_44, %c2_45, %c0_46, %c0_47] : memref<2x3x32x32xbf16, #tpu.memory_space<vmem>>, vector<1x1x32x32xbf16>
    %54 = vector.shape_cast %53 : vector<1x1x32x32xbf16> to vector<32x32xbf16>
    %cst_48 = arith.constant dense<0.000000e+00> : vector<16x32xf32>
    %55 = tpu.matmul %48, %54, %cst_48 {dimension_numbers = #tpu.dot_dimension_numbers<[1], [0], [0], [1], [0, 0, 1, 1], [], []>} : vector<16x32xbf16>, vector<32x32xbf16>, vector<16x32xf32> -> vector<16x32xf32>
    %56 = arith.addf %46, %55 : vector<16x32xf32>
    %57 = math.tanh %52 : vector<16x32xf32>
    %58 = arith.negf %56 : vector<16x32xf32>
    %59 = math.exp %58 : vector<16x32xf32>
    %cst_49 = arith.constant 1.000000e+00 : f32
    %60 = vector.broadcast %cst_49 : f32 to vector<16x32xf32>
    %61 = arith.addf %60, %59 : vector<16x32xf32>
    %62 = arith.divf %60, %61 : vector<16x32xf32>
    %63 = arith.mulf %57, %62 : vector<16x32xf32>
    %64 = arith.truncf %63 : vector<16x32xf32> to vector<16x32xbf16>
    %c0_50 = arith.constant 0 : index
    %c0_51 = arith.constant 0 : index
    %c0_52 = arith.constant 0 : index
    %65 = vector.load %arg11[%c0_50, %c0_51, %c0_52] : memref<2x32x32xbf16, #tpu.memory_space<vmem>>, vector<1x32x32xbf16>
    %66 = vector.shape_cast %65 : vector<1x32x32xbf16> to vector<32x32xbf16>
    %cst_53 = arith.constant dense<0.000000e+00> : vector<16x32xf32>
    %67 = tpu.matmul %64, %66, %cst_53 {dimension_numbers = #tpu.dot_dimension_numbers<[1], [0], [0], [1], [0, 0, 1, 1], [], []>} : vector<16x32xbf16>, vector<32x32xbf16>, vector<16x32xf32> -> vector<16x32xf32>
    %c0_54 = arith.constant 0 : index
    %c0_55 = arith.constant 0 : index
    %c0_56 = arith.constant 0 : index
    %68 = vector.load %arg13[%c0_54, %c0_55, %c0_56] : memref<2x1x32xf32, #tpu.memory_space<vmem>>, vector<1x1x32xf32>
    %69 = vector.shape_cast %68 : vector<1x1x32xf32> to vector<1x32xf32>
    %70 = vector.broadcast %69 : vector<1x32xf32> to vector<16x32xf32>
    %71 = arith.addf %67, %70 : vector<16x32xf32>
    %72 = arith.addf %19, %71 : vector<16x32xf32>
    %c0_57 = arith.constant 0 : index
    %c0_58 = arith.constant 0 : index
    %c0_59 = arith.constant 0 : index
    %73 = vector.load %arg10[%c0_57, %c0_58, %c0_59] : memref<2x32x32xbf16, #tpu.memory_space<vmem>>, vector<1x32x32xbf16>
    %74 = vector.shape_cast %73 : vector<1x32x32xbf16> to vector<32x32xbf16>
    %cst_60 = arith.constant dense<0.000000e+00> : vector<16x32xf32>
    %75 = tpu.matmul %64, %74, %cst_60 {dimension_numbers = #tpu.dot_dimension_numbers<[1], [0], [0], [1], [0, 0, 1, 1], [], []>} : vector<16x32xbf16>, vector<32x32xbf16>, vector<16x32xf32> -> vector<16x32xf32>
    %c0_61 = arith.constant 0 : index
    %c0_62 = arith.constant 0 : index
    %c0_63 = arith.constant 0 : index
    %76 = vector.load %arg12[%c0_61, %c0_62, %c0_63] : memref<2x1x32xf32, #tpu.memory_space<vmem>>, vector<1x1x32xf32>
    %77 = vector.shape_cast %76 : vector<1x1x32xf32> to vector<1x32xf32>
    %78 = vector.broadcast %77 : vector<1x32xf32> to vector<16x32xf32>
    %79 = arith.addf %75, %78 : vector<16x32xf32>
    %80 = arith.addf %18, %79 : vector<16x32xf32>
    %81 = arith.mulf %80, %8 : vector<16x32xf32>
    %c8_64 = arith.constant 8 : index
    %c0_65 = arith.constant 0 : index
    %82 = vector.load %arg19[%c8_64, %c0_65] : memref<32x32xf32, #tpu.memory_space<vmem>>, vector<16x32xf32>
    tpu.vector_store %arg19[%c8_64, %c0_65], %81 {strides = array<i32>} : memref<32x32xf32, #tpu.memory_space<vmem>>, vector<16x32xf32>,
    %c6 = arith.constant 6 : index
    %c0_66 = arith.constant 0 : index
    %83 = vector.load %arg19[%c6, %c0_66] : memref<32x32xf32, #tpu.memory_space<vmem>>, vector<16x32xf32>
    %84 = arith.truncf %83 : vector<16x32xf32> to vector<16x32xbf16>
    %c1_67 = arith.constant 1 : index
    %c0_68 = arith.constant 0 : index
    %c0_69 = arith.constant 0 : index
    %c0_70 = arith.constant 0 : index
    %85 = vector.load %arg6[%c1_67, %c0_68, %c0_69, %c0_70] : memref<2x3x32x32xbf16, #tpu.memory_space<vmem>>, vector<1x1x32x32xbf16>
    %86 = vector.shape_cast %85 : vector<1x1x32x32xbf16> to vector<32x32xbf16>
    %cst_71 = arith.constant dense<0.000000e+00> : vector<16x32xf32>
    %87 = tpu.matmul %84, %86, %cst_71 {dimension_numbers = #tpu.dot_dimension_numbers<[1], [0], [0], [1], [0, 0, 1, 1], [], []>} : vector<16x32xbf16>, vector<32x32xbf16>, vector<16x32xf32> -> vector<16x32xf32>
    %c1_72 = arith.constant 1 : index
    %c0_73 = arith.constant 0 : index
    %c0_74 = arith.constant 0 : index
    %88 = vector.load %arg8[%c1_72, %c0_73, %c0_74] : memref<2x1x32xf32, #tpu.memory_space<vmem>>, vector<1x1x32xf32>
    %89 = vector.shape_cast %88 : vector<1x1x32xf32> to vector<1x32xf32>
    %90 = vector.broadcast %89 : vector<1x32xf32> to vector<16x32xf32>
    %91 = arith.addf %87, %90 : vector<16x32xf32>
    %c1_75 = arith.constant 1 : index
    %c0_76 = arith.constant 0 : index
    %c0_77 = arith.constant 0 : index
    %c0_78 = arith.constant 0 : index
    %92 = vector.load %arg7[%c1_75, %c0_76, %c0_77, %c0_78] : memref<2x3x32x32xbf16, #tpu.memory_space<vmem>>, vector<1x1x32x32xbf16>
    %93 = vector.shape_cast %92 : vector<1x1x32x32xbf16> to vector<32x32xbf16>
    %cst_79 = arith.constant dense<0.000000e+00> : vector<16x32xf32>
    %94 = tpu.matmul %84, %93, %cst_79 {dimension_numbers = #tpu.dot_dimension_numbers<[1], [0], [0], [1], [0, 0, 1, 1], [], []>} : vector<16x32xbf16>, vector<32x32xbf16>, vector<16x32xf32> -> vector<16x32xf32>
    %c1_80 = arith.constant 1 : index
    %c0_81 = arith.constant 0 : index
    %c0_82 = arith.constant 0 : index
    %95 = vector.load %arg9[%c1_80, %c0_81, %c0_82] : memref<2x1x32xf32, #tpu.memory_space<vmem>>, vector<1x1x32xf32>
    %96 = vector.shape_cast %95 : vector<1x1x32xf32> to vector<1x32xf32>
    %97 = vector.broadcast %96 : vector<1x32xf32> to vector<16x32xf32>
    %98 = arith.addf %94, %97 : vector<16x32xf32>
    %c8_83 = arith.constant 8 : index
    %c0_84 = arith.constant 0 : index
    %99 = vector.load %arg19[%c8_83, %c0_84] : memref<32x32xf32, #tpu.memory_space<vmem>>, vector<16x32xf32>
    %100 = arith.truncf %99 : vector<16x32xf32> to vector<16x32xbf16>
    %c1_85 = arith.constant 1 : index
    %c1_86 = arith.constant 1 : index
    %c0_87 = arith.constant 0 : index
    %c0_88 = arith.constant 0 : index
    %101 = vector.load %arg6[%c1_85, %c1_86, %c0_87, %c0_88] : memref<2x3x32x32xbf16, #tpu.memory_space<vmem>>, vector<1x1x32x32xbf16>
    %102 = vector.shape_cast %101 : vector<1x1x32x32xbf16> to vector<32x32xbf16>
    %cst_89 = arith.constant dense<0.000000e+00> : vector<16x32xf32>
    %103 = tpu.matmul %100, %102, %cst_89 {dimension_numbers = #tpu.dot_dimension_numbers<[1], [0], [0], [1], [0, 0, 1, 1], [], []>} : vector<16x32xbf16>, vector<32x32xbf16>, vector<16x32xf32> -> vector<16x32xf32>
    %104 = arith.addf %91, %103 : vector<16x32xf32>
    %c1_90 = arith.constant 1 : index
    %c1_91 = arith.constant 1 : index
    %c0_92 = arith.constant 0 : index
    %c0_93 = arith.constant 0 : index
    %105 = vector.load %arg7[%c1_90, %c1_91, %c0_92, %c0_93] : memref<2x3x32x32xbf16, #tpu.memory_space<vmem>>, vector<1x1x32x32xbf16>
    %106 = vector.shape_cast %105 : vector<1x1x32x32xbf16> to vector<32x32xbf16>
    %cst_94 = arith.constant dense<0.000000e+00> : vector<16x32xf32>
    %107 = tpu.matmul %100, %106, %cst_94 {dimension_numbers = #tpu.dot_dimension_numbers<[1], [0], [0], [1], [0, 0, 1, 1], [], []>} : vector<16x32xbf16>, vector<32x32xbf16>, vector<16x32xf32> -> vector<16x32xf32>
    %108 = arith.addf %98, %107 : vector<16x32xf32>
    %c10 = arith.constant 10 : index
    %c0_95 = arith.constant 0 : index
    %109 = vector.load %arg19[%c10, %c0_95] : memref<32x32xf32, #tpu.memory_space<vmem>>, vector<16x32xf32>
    %110 = arith.truncf %109 : vector<16x32xf32> to vector<16x32xbf16>
    %c1_96 = arith.constant 1 : index
    %c2_97 = arith.constant 2 : index
    %c0_98 = arith.constant 0 : index
    %c0_99 = arith.constant 0 : index
    %111 = vector.load %arg6[%c1_96, %c2_97, %c0_98, %c0_99] : memref<2x3x32x32xbf16, #tpu.memory_space<vmem>>, vector<1x1x32x32xbf16>
    %112 = vector.shape_cast %111 : vector<1x1x32x32xbf16> to vector<32x32xbf16>
    %cst_100 = arith.constant dense<0.000000e+00> : vector<16x32xf32>
    %113 = tpu.matmul %110, %112, %cst_100 {dimension_numbers = #tpu.dot_dimension_numbers<[1], [0], [0], [1], [0, 0, 1, 1], [], []>} : vector<16x32xbf16>, vector<32x32xbf16>, vector<16x32xf32> -> vector<16x32xf32>
    %114 = arith.addf %104, %113 : vector<16x32xf32>
    %c1_101 = arith.constant 1 : index
    %c2_102 = arith.constant 2 : index
    %c0_103 = arith.constant 0 : index
    %c0_104 = arith.constant 0 : index
    %115 = vector.load %arg7[%c1_101, %c2_102, %c0_103, %c0_104] : memref<2x3x32x32xbf16, #tpu.memory_space<vmem>>, vector<1x1x32x32xbf16>
    %116 = vector.shape_cast %115 : vector<1x1x32x32xbf16> to vector<32x32xbf16>
    %cst_105 = arith.constant dense<0.000000e+00> : vector<16x32xf32>
    %117 = tpu.matmul %110, %116, %cst_105 {dimension_numbers = #tpu.dot_dimension_numbers<[1], [0], [0], [1], [0, 0, 1, 1], [], []>} : vector<16x32xbf16>, vector<32x32xbf16>, vector<16x32xf32> -> vector<16x32xf32>
    %118 = arith.addf %108, %117 : vector<16x32xf32>
    %119 = math.tanh %114 : vector<16x32xf32>
    %120 = arith.negf %118 : vector<16x32xf32>
    %121 = math.exp %120 : vector<16x32xf32>
    %cst_106 = arith.constant 1.000000e+00 : f32
    %122 = vector.broadcast %cst_106 : f32 to vector<16x32xf32>
    %123 = arith.addf %122, %121 : vector<16x32xf32>
    %124 = arith.divf %122, %123 : vector<16x32xf32>
    %125 = arith.mulf %119, %124 : vector<16x32xf32>
    %126 = arith.truncf %125 : vector<16x32xf32> to vector<16x32xbf16>
    %c1_107 = arith.constant 1 : index
    %c0_108 = arith.constant 0 : index
    %c0_109 = arith.constant 0 : index
    %127 = vector.load %arg11[%c1_107, %c0_108, %c0_109] : memref<2x32x32xbf16, #tpu.memory_space<vmem>>, vector<1x32x32xbf16>
    %128 = vector.shape_cast %127 : vector<1x32x32xbf16> to vector<32x32xbf16>
    %cst_110 = arith.constant dense<0.000000e+00> : vector<16x32xf32>
    %129 = tpu.matmul %126, %128, %cst_110 {dimension_numbers = #tpu.dot_dimension_numbers<[1], [0], [0], [1], [0, 0, 1, 1], [], []>} : vector<16x32xbf16>, vector<32x32xbf16>, vector<16x32xf32> -> vector<16x32xf32>
    %c1_111 = arith.constant 1 : index
    %c0_112 = arith.constant 0 : index
    %c0_113 = arith.constant 0 : index
    %130 = vector.load %arg13[%c1_111, %c0_112, %c0_113] : memref<2x1x32xf32, #tpu.memory_space<vmem>>, vector<1x1x32xf32>
    %131 = vector.shape_cast %130 : vector<1x1x32xf32> to vector<1x32xf32>
    %132 = vector.broadcast %131 : vector<1x32xf32> to vector<16x32xf32>
    %133 = arith.addf %129, %132 : vector<16x32xf32>
    %134 = arith.addf %72, %133 : vector<16x32xf32>
    %135 = arith.mulf %134, %8 : vector<16x32xf32>
    %136 = arith.truncf %135 : vector<16x32xf32> to vector<16x32xbf16>
    %c0_114 = arith.constant 0 : index
    %c0_115 = arith.constant 0 : index
    %137 = vector.load %arg14[%c0_114, %c0_115] : memref<32x16xbf16, #tpu.memory_space<vmem>>, vector<32x16xbf16>
    %cst_116 = arith.constant dense<0.000000e+00> : vector<16x16xf32>
    %138 = tpu.matmul %136, %137, %cst_116 {dimension_numbers = #tpu.dot_dimension_numbers<[1], [0], [0], [1], [0, 0, 1, 1], [], []>} : vector<16x32xbf16>, vector<32x16xbf16>, vector<16x16xf32> -> vector<16x16xf32>
    %c0_117 = arith.constant 0 : index
    %c0_118 = arith.constant 0 : index
    %139 = vector.load %arg15[%c0_117, %c0_118] : memref<1x16xf32, #tpu.memory_space<vmem>>, vector<1x16xf32>
    %140 = vector.broadcast %139 : vector<1x16xf32> to vector<16x16xf32>
    %141 = arith.addf %138, %140 : vector<16x16xf32>
    %c0_119 = arith.constant 0 : index
    %c0_120 = arith.constant 0 : index
    %142 = vector.load %arg16[%c0_119, %c0_120] : memref<32x16xbf16, #tpu.memory_space<vmem>>, vector<32x16xbf16>
    %cst_121 = arith.constant dense<0.000000e+00> : vector<16x16xf32>
    %143 = tpu.matmul %136, %142, %cst_121 {dimension_numbers = #tpu.dot_dimension_numbers<[1], [0], [0], [1], [0, 0, 1, 1], [], []>} : vector<16x32xbf16>, vector<32x16xbf16>, vector<16x16xf32> -> vector<16x16xf32>
    %c0_122 = arith.constant 0 : index
    %c0_123 = arith.constant 0 : index
    %144 = vector.load %arg17[%c0_122, %c0_123] : memref<1x16xf32, #tpu.memory_space<vmem>>, vector<1x16xf32>
    %145 = vector.broadcast %144 : vector<1x16xf32> to vector<16x16xf32>
    %146 = arith.addf %143, %145 : vector<16x16xf32>
    %c0_124 = arith.constant 0 : index
    %c0_125 = arith.constant 0 : index
    %c0_126 = arith.constant 0 : index
    %147 = vector.load %arg3[%c0_124, %c0_125, %c0_126] : memref<1x16x16xf32, #tpu.memory_space<vmem>>, vector<1x16x16xf32>
    %148 = vector.shape_cast %147 : vector<1x16x16xf32> to vector<16x16xf32>
    %149 = math.exp %146 : vector<16x16xf32>
    %150 = arith.mulf %148, %149 : vector<16x16xf32>
    %151 = arith.addf %141, %150 : vector<16x16xf32>
    %c0_127 = arith.constant 0 : index
    %c0_128 = arith.constant 0 : index
    %c0_129 = arith.constant 0 : index
    %c0_130 = arith.constant 0 : index
    %152 = vector.load %arg18[%c0_127, %c0_128, %c0_129, %c0_130] : memref<1x3x16x16xf32, #tpu.memory_space<vmem>>, vector<1x1x16x16xf32>
    %153 = vector.shape_cast %152 : vector<1x1x16x16xf32> to vector<16x16xf32>
    %154 = vector.shape_cast %151 : vector<16x16xf32> to vector<1x1x16x16xf32>
    tpu.vector_store %arg18[%c0_127, %c0_128, %c0_129, %c0_130], %154 {strides = array<i32>} : memref<1x3x16x16xf32, #tpu.memory_space<vmem>>, vector<1x1x16x16xf32>,
    %c0_131 = arith.constant 0 : index
    %c1_132 = arith.constant 1 : index
    %c0_133 = arith.constant 0 : index
    %c0_134 = arith.constant 0 : index
    %155 = vector.load %arg18[%c0_131, %c1_132, %c0_133, %c0_134] : memref<1x3x16x16xf32, #tpu.memory_space<vmem>>, vector<1x1x16x16xf32>
    %156 = vector.shape_cast %155 : vector<1x1x16x16xf32> to vector<16x16xf32>
    %157 = vector.shape_cast %141 : vector<16x16xf32> to vector<1x1x16x16xf32>
    tpu.vector_store %arg18[%c0_131, %c1_132, %c0_133, %c0_134], %157 {strides = array<i32>} : memref<1x3x16x16xf32, #tpu.memory_space<vmem>>, vector<1x1x16x16xf32>,
    %c0_135 = arith.constant 0 : index
    %c2_136 = arith.constant 2 : index
    %c0_137 = arith.constant 0 : index
    %c0_138 = arith.constant 0 : index
    %158 = vector.load %arg18[%c0_135, %c2_136, %c0_137, %c0_138] : memref<1x3x16x16xf32, #tpu.memory_space<vmem>>, vector<1x1x16x16xf32>
    %159 = vector.shape_cast %158 : vector<1x1x16x16xf32> to vector<16x16xf32>
    %160 = vector.shape_cast %146 : vector<16x16xf32> to vector<1x1x16x16xf32>
    tpu.vector_store %arg18[%c0_135, %c2_136, %c0_137, %c0_138], %160 {strides = array<i32>} : memref<1x3x16x16xf32, #tpu.memory_space<vmem>>, vector<1x1x16x16xf32>,
    return
  }
  func.func @transform_0(%arg0: i32, %arg1: memref<2xi32, #tpu.memory_space<smem>>) -> (i32, i32, i32) {
    %c0_i32 = arith.constant 0 : i32
    %c0_i32_0 = arith.constant 0 : i32
    %c0_i32_1 = arith.constant 0 : i32
    return %arg0, %c0_i32, %c0_i32_0 : i32, i32, i32
  }
  func.func @transform_1(%arg0: i32, %arg1: memref<2xi32, #tpu.memory_space<smem>>) -> (i32, i32, i32) {
    %c0_i32 = arith.constant 0 : i32
    %c0_i32_0 = arith.constant 0 : i32
    %c0_i32_1 = arith.constant 0 : i32
    return %arg0, %c0_i32, %c0_i32_0 : i32, i32, i32
  }
  func.func @transform_2(%arg0: i32, %arg1: memref<2xi32, #tpu.memory_space<smem>>) -> (i32, i32) {
    %c0_i32 = arith.constant 0 : i32
    %c0_i32_0 = arith.constant 0 : i32
    %c0_i32_1 = arith.constant 0 : i32
    return %c0_i32, %c0_i32_0 : i32, i32
  }
  func.func @transform_3(%arg0: i32, %arg1: memref<2xi32, #tpu.memory_space<smem>>) -> (i32, i32) {
    %c0_i32 = arith.constant 0 : i32
    %c0_i32_0 = arith.constant 0 : i32
    %c0_i32_1 = arith.constant 0 : i32
    return %c0_i32, %c0_i32_0 : i32, i32
  }
  func.func @transform_4(%arg0: i32, %arg1: memref<2xi32, #tpu.memory_space<smem>>) -> (i32, i32, i32, i32) {
    %c0_i32 = arith.constant 0 : i32
    %c0_i32_0 = arith.constant 0 : i32
    %c0_i32_1 = arith.constant 0 : i32
    %c0_i32_2 = arith.constant 0 : i32
    %c0_i32_3 = arith.constant 0 : i32
    return %c0_i32, %c0_i32_0, %c0_i32_1, %c0_i32_2 : i32, i32, i32, i32
  }
  func.func @transform_5(%arg0: i32, %arg1: memref<2xi32, #tpu.memory_space<smem>>) -> (i32, i32, i32, i32) {
    %c0_i32 = arith.constant 0 : i32
    %c0_i32_0 = arith.constant 0 : i32
    %c0_i32_1 = arith.constant 0 : i32
    %c0_i32_2 = arith.constant 0 : i32
    %c0_i32_3 = arith.constant 0 : i32
    return %c0_i32, %c0_i32_0, %c0_i32_1, %c0_i32_2 : i32, i32, i32, i32
  }
  func.func @transform_6(%arg0: i32, %arg1: memref<2xi32, #tpu.memory_space<smem>>) -> (i32, i32, i32) {
    %c0_i32 = arith.constant 0 : i32
    %c0_i32_0 = arith.constant 0 : i32
    %c0_i32_1 = arith.constant 0 : i32
    %c0_i32_2 = arith.constant 0 : i32
    return %c0_i32, %c0_i32_0, %c0_i32_1 : i32, i32, i32
  }
  func.func @transform_7(%arg0: i32, %arg1: memref<2xi32, #tpu.memory_space<smem>>) -> (i32, i32, i32) {
    %c0_i32 = arith.constant 0 : i32
    %c0_i32_0 = arith.constant 0 : i32
    %c0_i32_1 = arith.constant 0 : i32
    %c0_i32_2 = arith.constant 0 : i32
    return %c0_i32, %c0_i32_0, %c0_i32_1 : i32, i32, i32
  }
  func.func @transform_8(%arg0: i32, %arg1: memref<2xi32, #tpu.memory_space<smem>>) -> (i32, i32, i32) {
    %c0_i32 = arith.constant 0 : i32
    %c0_i32_0 = arith.constant 0 : i32
    %c0_i32_1 = arith.constant 0 : i32
    %c0_i32_2 = arith.constant 0 : i32
    return %c0_i32, %c0_i32_0, %c0_i32_1 : i32, i32, i32
  }
  func.func @transform_9(%arg0: i32, %arg1: memref<2xi32, #tpu.memory_space<smem>>) -> (i32, i32, i32) {
    %c0_i32 = arith.constant 0 : i32
    %c0_i32_0 = arith.constant 0 : i32
    %c0_i32_1 = arith.constant 0 : i32
    %c0_i32_2 = arith.constant 0 : i32
    return %c0_i32, %c0_i32_0, %c0_i32_1 : i32, i32, i32
  }
  func.func @transform_10(%arg0: i32, %arg1: memref<2xi32, #tpu.memory_space<smem>>) -> (i32, i32, i32) {
    %c0_i32 = arith.constant 0 : i32
    %c0_i32_0 = arith.constant 0 : i32
    %c0_i32_1 = arith.constant 0 : i32
    %c0_i32_2 = arith.constant 0 : i32
    return %c0_i32, %c0_i32_0, %c0_i32_1 : i32, i32, i32
  }
  func.func @transform_11(%arg0: i32, %arg1: memref<2xi32, #tpu.memory_space<smem>>) -> (i32, i32, i32) {
    %c0_i32 = arith.constant 0 : i32
    %c0_i32_0 = arith.constant 0 : i32
    %c0_i32_1 = arith.constant 0 : i32
    %c0_i32_2 = arith.constant 0 : i32
    return %c0_i32, %c0_i32_0, %c0_i32_1 : i32, i32, i32
  }
  func.func @transform_12(%arg0: i32, %arg1: memref<2xi32, #tpu.memory_space<smem>>) -> (i32, i32) {
    %c0_i32 = arith.constant 0 : i32
    %c0_i32_0 = arith.constant 0 : i32
    %c0_i32_1 = arith.constant 0 : i32
    return %c0_i32, %c0_i32_0 : i32, i32
  }
  func.func @transform_13(%arg0: i32, %arg1: memref<2xi32, #tpu.memory_space<smem>>) -> (i32, i32) {
    %c0_i32 = arith.constant 0 : i32
    %c0_i32_0 = arith.constant 0 : i32
    %c0_i32_1 = arith.constant 0 : i32
    return %c0_i32, %c0_i32_0 : i32, i32
  }
  func.func @transform_14(%arg0: i32, %arg1: memref<2xi32, #tpu.memory_space<smem>>) -> (i32, i32) {
    %c0_i32 = arith.constant 0 : i32
    %c0_i32_0 = arith.constant 0 : i32
    %c0_i32_1 = arith.constant 0 : i32
    return %c0_i32, %c0_i32_0 : i32, i32
  }
  func.func @transform_15(%arg0: i32, %arg1: memref<2xi32, #tpu.memory_space<smem>>) -> (i32, i32) {
    %c0_i32 = arith.constant 0 : i32
    %c0_i32_0 = arith.constant 0 : i32
    %c0_i32_1 = arith.constant 0 : i32
    return %c0_i32, %c0_i32_0 : i32, i32
  }
  func.func @transform_16(%arg0: i32, %arg1: memref<2xi32, #tpu.memory_space<smem>>) -> (i32, i32, i32, i32) {
    %c0_i32 = arith.constant 0 : i32
    %c0_i32_0 = arith.constant 0 : i32
    %c0_i32_1 = arith.constant 0 : i32
    %c0_i32_2 = arith.constant 0 : i32
    return %arg0, %c0_i32, %c0_i32_0, %c0_i32_1 : i32, i32, i32, i32
  }
}

</mosaic_0001>

<bundles_post_ra>
// kernel: tpu_custom_call.1
= control target key start
LH: loop header
LB: loop body
LE: loop exit
PB: predicated region body
PF: predicated region fallthrough
CT: control target
= control target key end

     0   :  { %s4308_s0 = inlined_call_operand.hbm [shape: s32[2], index: 0, kind: input, shape index: {}]   ;;  %s4309_s1 = inlined_call_operand.hbm [shape: bf16[2,16,8], index: 1, kind: input, shape index: {}]   ;;  %s4310_s2 = inlined_call_operand.hbm [shape: f32[2,16,16], index: 2, kind: input, shape index: {}]   ;;  %s4311_s3 = inlined_call_operand.hbm [shape: bf16[8,32], index: 3, kind: input, shape index: {}]   ;;  %s4312_s4 = inlined_call_operand.hbm [shape: f32[1,32], index: 4, kind: input, shape index: {}]   ;;  %s4313_s5 = inlined_call_operand.hbm [shape: bf16[2,3,32,32], index: 5, kind: input, shape index: {}]   ;;  %s4314_s6 = inlined_call_operand.hbm [shape: bf16[2,3,32,32], index: 6, kind: input, shape index: {}]   ;;  %s4315_s7 = inlined_call_operand.hbm [shape: f32[2,1,32], index: 7, kind: input, shape index: {}]   ;;  %s4316_s8 = inlined_call_operand.hbm [shape: f32[2,1,32], index: 8, kind: input, shape index: {}]   ;;  %s4317_s9 = inlined_call_operand.hbm [shape: bf16[2,32,32], index: 9, kind: input, shape index: {}]   ;;  %s4318_s10 = inlined_call_operand.hbm [shape: bf16[2,32,32], index: 10, kind: input, shape index: {}]   ;;  %s4319_s11 = inlined_call_operand.hbm [shape: f32[2,1,32], index: 11, kind: input, shape index: {}]   ;;  %s4320_s12 = inlined_call_operand.hbm [shape: f32[2,1,32], index: 12, kind: input, shape index: {}]   ;;  %s4321_s13 = inlined_call_operand.hbm [shape: bf16[32,16], index: 13, kind: input, shape index: {}]   ;;  %s4322_s14 = inlined_call_operand.hbm [shape: f32[1,16], index: 14, kind: input, shape index: {}]   ;;  %s4323_s15 = inlined_call_operand.hbm [shape: bf16[32,16], index: 15, kind: input, shape index: {}]   ;;  %s4324_s16 = inlined_call_operand.hbm [shape: f32[1,16], index: 16, kind: input, shape index: {}]   ;;  %s4325_s17 = inlined_call_operand.hbm [shape: f32[2,3,16,16], index: 17, kind: output, shape index: {}]  }
   0x1   :  { %4347 = sst [smem:[#allocation49_spill]] %s4308_s0 }
   0x2   :  { %4348 = sst [smem:[#allocation50_spill]] %s4309_s1  ;;  %s4359_s26 = sld [smem:[#allocation49_spill]] }
   0x3   :  { %4349 = sst [smem:[#allocation51_spill]] %s4310_s2 }
   0x4   :  { %4350 = sst [smem:[#allocation52_spill]] %s4311_s3 }
   0x5   :  { %4351 = sst [smem:[#allocation53_spill]] %s4312_s4 }
   0x6   :  { %4352 = sst [smem:[#allocation54_spill]] %s4313_s5 }
   0x7   :  { %4353 = sst [smem:[#allocation55_spill]] %s4314_s6 }
   0x8   :  { %4354 = sst [smem:[#allocation56_spill]] %s4315_s7  ;;  %s2910_s2 = scalar_lea.hbm %s4359_s26, 16 }
   0x9   :  { %4355 = sst [smem:[#allocation57_spill]] %s4316_s8  ;;  %p2911_p0 = scmp.ne.s32.totalorder %s4359_s26, %s2910_s2 }
   0xa   :  { %4356 = sst [smem:[#allocation58_spill]] %s4317_s9  ;;  %p2914_p1 = scmp.lt.u32.totalorder %s2910_s2, %s4359_s26 }
   0xb   :  { %4357 = sst [smem:[#allocation59_spill]] %s4318_s10 }
   0xc   :  { %4358 = sst [smem:[#allocation60_spill]] %s4325_s17  ;;  %p2916_p2 = pnand %p2914_p1, %p2911_p0 }
   0xe   :  { %2919 = shalt.err (!%p2916_p2)  }
   0xf   :  { %s3478_s30 = smov [#allocation4]  }
  0x10   :  { %23 = dma.hbm_to_smem %s4359_s26, 16, %s3478_s30, [#allocation3] }
  0x11   :  { %3416 = dma.done.wait [#allocation3], 16 }
  0x12   :  { %3417 = vsyncadd [#allocation3], 4294967280 }
  0x13   :  { %25 = sfence }
  0x14   :  { %26 = vsyncpa [#allocation6], 0 }
  0x15   :  { %28 = vsyncpa [#allocation6 + $0x1], 0 }
  0x16   :  { %29 = vsyncpa [#allocation9], 0 }
  0x17   :  { %31 = vsyncpa [#allocation9 + $0x1], 0 }
  0x18   :  { %32 = vsyncpa [#allocation12], 0 }
  0x19   :  { %33 = vsyncpa [#allocation15], 0 }
  0x1a   :  { %34 = vsyncpa [#allocation18], 0 }
  0x1b   :  { %35 = vsyncpa [#allocation21], 0 }
  0x1c   :  { %36 = vsyncpa [#allocation24], 0 }
  0x1d   :  { %37 = vsyncpa [#allocation27], 0 }
  0x1e   :  { %38 = vsyncpa [#allocation30], 0 }
  0x1f   :  { %39 = vsyncpa [#allocation7], 0 }
  0x20   :  { %41 = vsyncpa [#allocation7 + $0x1], 0  ;;  %s3608_s2 = smov 0   ;;  %s3610_s1 = smov 0  }
  0x21   :  { %s3612_s20 = smov 0   ;;  %s3614_s21 = smov 0  }
  0x22 LB: > { %4360 = sst [smem:[#allocation44_spill]] %s3464_s2  ;;  %s3479_s22 = smov [#allocation10]   ;;  %s3476_s21 = sphi %s3614_s21, %s4421_s21   ;;  %s3472_s20 = sphi %s3612_s20, %s4420_s20   ;;  %s3468_s1 = sphi %s3610_s1, %s4419_s1   ;;  %s3464_s2 = sphi %s3608_s2, %s4418_s2  }
  0x23   : > { %4361 = sst [smem:[#allocation45_spill]] %s3468_s1  ;;  %s437_s23 = sshll.u32 %s3479_s22, 4  ;;  %s438_s23 = int_to_ptr.vmem [resolvable:$true] %s437_s23 }
  0x24   : > { %4362 = sst [smem:[#allocation46_spill]] %s3472_s20  ;;  %s3629_s24 = sadd.s32 4294967295, %s3476_s21  }
  0x25   : > { %4363 = sst [smem:[#allocation47_spill]] %s3629_s24  ;;  %p2282_p3 = scmp.ge.s32.totalorder %s3476_s21, 1 }
  0x26   : > { %p4331_p4 = scmp.eq.s32.totalorder %s3629_s24, 0  ;;  %p424_p5 = scmp.lt.s32.totalorder %s3476_s21, 3 }
  0x27   : > { %s3480_s26 = smov [#allocation11]   ;;  %s3481_s29 = smov [#allocation14]  }
  0x28   : > { %p3634_p6 = pnand %p2282_p3, %p424_p5  ;;  %s448_s27 = sshll.u32 %s3480_s26, 4  ;;  %s3641_s27 = int_to_ptr.vmem [resolvable:$true] %s448_s27 }
  0x29   : > { %s471_s0 = sshll.u32 %s3481_s29, 4  ;;  %s4367_s3 = sld [smem:[#allocation52_spill]]  ;;  %s3649_s0 = int_to_ptr.vmem [resolvable:$true] %s471_s0 }
  0x2a   : > { %s4364_s25 = scalar_select %p3634_p6, 1, 0 }
  0x2b   : > { %p2706_p8 = pneg %p3634_p6 }
  0x2c   : > { %4365 = sst [smem:[#allocation48_spill]] %s4364_s25 }
  0x2d   : > { %p3645_p9 = pnand %p2706_p8, %p4331_p4 }
  0x2f   : > { %s2920_s19 = scalar_lea.hbm %s4367_s3, 64  ;;  %p3659_p11 = pneg %p3645_p9 }
  0x30   : > { %p2921_p10 = scmp.ne.s32.totalorder %s4367_s3, %s2920_s19  ;;  %p2927_p0 = scmp.lt.u32.totalorder %s2920_s19, %s4367_s3 }
  0x32   : > { %p2923_p12 = pnand %p3659_p11, %p2921_p10 }
  0x34   : > { %p2924_p13 = pneg %p2923_p12 }
  0x36   : > { %p2929_p1 = pnand %p2927_p0, %p2924_p13 }
  0x38   : > { %2932 = shalt.err (!%p2929_p1)
}
  0x39   : > { %s2933_s30 = scalar_lea.vmem %s438_s23, 64  ;;  %p2941_p8 = scmp.lt.s32.totalorder %s438_s23, %s438_s23 }
  0x3a   : > { %p2934_p2 = scmp.ne.s32.totalorder %s438_s23, %s2933_s30  ;;  %p2942_p7 = scmp.lt.s32.totalorder %s2933_s30, %s2933_s30 }
  0x3c   : > { %p2936_p3 = pnand %p2934_p2, %p3659_p11  ;;  %p2943_p4 = por %p2942_p7, %p2941_p8 }
  0x3e   : > { %p2937_p5 = pneg %p2936_p3 }
  0x40   : > { %p2944_p6 = pnand %p2943_p4, %p2937_p5 }
  0x42   : > { %2947 = shalt.err (!%p2944_p6)
}
  0x43   : > { %2709 = dma.hbm_to_vmem [thread:$0]  (!%p3645_p9), %s4367_s3, 64, %s438_s23, [#allocation9]  }
  0x44   : > { %s4369_s4 = sld [smem:[#allocation53_spill]] }
  0x4a   : > { %s2948_s22 = scalar_lea.hbm %s4369_s4, 16 }
  0x4b   : > { %p2949_p10 = scmp.ne.s32.totalorder %s4369_s4, %s2948_s22  ;;  %p2955_p4 = scmp.lt.u32.totalorder %s2948_s22, %s4369_s4 }
  0x4d   : > { %p2951_p12 = pnand %p2949_p10, %p3659_p11 }
  0x4f   : > { %p2952_p7 = pneg %p2951_p12 }
  0x51   : > { %p2957_p6 = pnand %p2955_p4, %p2952_p7 }
  0x53   : > { %2960 = shalt.err (!%p2957_p6)
}
  0x54   : > { %s2961_s23 = scalar_lea.vmem %s3641_s27, 16  ;;  %s2968_s24 = scalar_lea.vmem %s3641_s27, 32 }
  0x55   : > { %p2962_p13 = scmp.ne.s32.totalorder %s3641_s27, %s2961_s23  ;;  %p2969_p2 = scmp.lt.s32.totalorder %s3641_s27, %s3641_s27 }
  0x56   : > { %p2970_p3 = scmp.lt.s32.totalorder %s2968_s24, %s2961_s23 }
  0x57   : > { %p2964_p0 = pnand %p2962_p13, %p3659_p11 }
  0x58   : > { %p2971_p5 = por %p2970_p3, %p2969_p2 }
  0x59   : > { %p2965_p1 = pneg %p2964_p0 }
  0x5b   : > { %p2972_p8 = pnand %p2971_p5, %p2965_p1 }
  0x5d   : > { %2975 = shalt.err (!%p2972_p8)
}
  0x5e   : > { %2712 = dma.hbm_to_vmem [thread:$0]  (!%p3645_p9), %s4369_s4, 16, %s3641_s27, [#allocation12]  }
  0x5f   : > { %s4370_s6 = sld [smem:[#allocation55_spill]] }
  0x65   : > { %s2976_s19 = scalar_lea.hbm %s4370_s6, 1536 }
  0x66   : > { %p2977_p10 = scmp.ne.s32.totalorder %s4370_s6, %s2976_s19  ;;  %p2983_p4 = scmp.lt.u32.totalorder %s2976_s19, %s4370_s6 }
  0x68   : > { %p2979_p12 = pnand %p2977_p10, %p3659_p11 }
  0x6a   : > { %p2980_p7 = pneg %p2979_p12 }
  0x6c   : > { %p2985_p6 = pnand %p2983_p4, %p2980_p7 }
  0x6e   : > { %2988 = shalt.err (!%p2985_p6)
}
  0x6f   : > { %s2989_s27 = scalar_lea.vmem %s3649_s0, 1536  ;;  %p2997_p2 = scmp.lt.s32.totalorder %s3649_s0, %s3649_s0 }
  0x70   : > { %p2990_p13 = scmp.ne.s32.totalorder %s3649_s0, %s2989_s27  ;;  %p2998_p3 = scmp.lt.s32.totalorder %s2989_s27, %s2989_s27 }
  0x72   : > { %p2992_p0 = pnand %p2990_p13, %p3659_p11  ;;  %p2999_p5 = por %p2998_p3, %p2997_p2 }
  0x74   : > { %p2993_p1 = pneg %p2992_p0 }
  0x76   : > { %p3000_p8 = pnand %p2999_p5, %p2993_p1 }
  0x78   : > { %3003 = shalt.err (!%p3000_p8)
}
  0x79   : > { %s4342_s24 = smov 64   ;;  %s4344_s2 = smov 4  }
  0x7a   : > { %2718 = dma.hbm_to_vmem [thread:$0]  (!%p3645_p9), %s4370_s6, 1536, %s3649_s0, [#allocation15], %s4342_s24, %s4342_s24, %s4344_s2  }
  0x7b   : > { %s3484_s25 = smov [#allocation17]   ;;  %s3485_s22 = smov [#allocation20]  }
  0x7c   : > { %s497_s19 = sshll.u32 %s3484_s25, 4  ;;  %s523_s29 = sshll.u32 %s3485_s22, 4  ;;  %s498_s19 = int_to_ptr.vmem [resolvable:$true] %s497_s19  ;;  %s524_s29 = int_to_ptr.vmem [resolvable:$true] %s523_s29 }
  0x7d   : > { %s4371_s8 = sld [smem:[#allocation57_spill]] }
  0x83   : > { %s3004_s27 = scalar_lea.hbm %s4371_s8, 32 }
  0x84   : > { %p3005_p10 = scmp.ne.s32.totalorder %s4371_s8, %s3004_s27  ;;  %p3011_p4 = scmp.lt.u32.totalorder %s3004_s27, %s4371_s8 }
  0x86   : > { %p3007_p12 = pnand %p3005_p10, %p3659_p11 }
  0x88   : > { %p3008_p7 = pneg %p3007_p12 }
  0x8a   : > { %p3013_p6 = pnand %p3011_p4, %p3008_p7 }
  0x8c   : > { %3016 = shalt.err (!%p3013_p6)
}
  0x8d   : > { %s3017_s0 = scalar_lea.vmem %s498_s19, 32  ;;  %p3025_p2 = scmp.lt.s32.totalorder %s498_s19, %s498_s19 }
  0x8e   : > { %p3018_p13 = scmp.ne.s32.totalorder %s498_s19, %s3017_s0  ;;  %p3026_p3 = scmp.lt.s32.totalorder %s3017_s0, %s3017_s0 }
  0x90   : > { %p3020_p0 = pnand %p3018_p13, %p3659_p11  ;;  %p3027_p5 = por %p3026_p3, %p3025_p2 }
  0x92   : > { %p3021_p1 = pneg %p3020_p0 }
  0x94   : > { %p3028_p8 = pnand %p3027_p5, %p3021_p1 }
  0x96   : > { %3031 = shalt.err (!%p3028_p8)
}
  0x97   : > { %s4338_s3 = smov 16   ;;  %s4340_s4 = smov 1  }
  0x98   : > { %2724 = dma.hbm_to_vmem [thread:$0]  (!%p3645_p9), %s4371_s8, 32, %s498_s19, [#allocation18], %s4338_s3, %s4338_s3, %s4340_s4  }
  0x99   : > { %s4372_s10 = sld [smem:[#allocation59_spill]] }
  0x9f   : > { %s3032_s25 = scalar_lea.hbm %s4372_s10, 512 }
  0xa0   : > { %p3033_p10 = scmp.ne.s32.totalorder %s4372_s10, %s3032_s25  ;;  %p3039_p4 = scmp.lt.u32.totalorder %s3032_s25, %s4372_s10 }
  0xa2   : > { %p3035_p12 = pnand %p3033_p10, %p3659_p11 }
  0xa4   : > { %p3036_p7 = pneg %p3035_p12 }
  0xa6   : > { %p3041_p6 = pnand %p3039_p4, %p3036_p7 }
  0xa8   : > { %3044 = shalt.err (!%p3041_p6)
}
  0xa9   : > { %s3045_s0 = scalar_lea.vmem %s524_s29, 512  ;;  %p3053_p2 = scmp.lt.s32.totalorder %s524_s29, %s524_s29 }
  0xaa   : > { %p3046_p13 = scmp.ne.s32.totalorder %s524_s29, %s3045_s0  ;;  %p3054_p3 = scmp.lt.s32.totalorder %s3045_s0, %s3045_s0 }
  0xac   : > { %p3048_p0 = pnand %p3046_p13, %p3659_p11  ;;  %p3055_p5 = por %p3054_p3, %p3053_p2 }
  0xae   : > { %p3049_p1 = pneg %p3048_p0 }
  0xb0   : > { %p3056_p8 = pnand %p3055_p5, %p3049_p1 }
  0xb2   : > { %3059 = shalt.err (!%p3056_p8)
}
  0xb3   : > { %2730 = dma.hbm_to_vmem [thread:$0]  (!%p3645_p9), %s4372_s10, 512, %s524_s29, [#allocation21], %s4342_s24, %s4342_s24, %s4344_s2  }
  0xb4   : > { %s3488_s20 = smov [#allocation23]   ;;  %s3489_s18 = smov [#allocation26]  }
  0xb5   : > { %s549_s17 = sshll.u32 %s3488_s20, 4  ;;  %s576_s25 = sshll.u32 %s3489_s18, 4  ;;  %s550_s17 = int_to_ptr.vmem [resolvable:$true] %s549_s17  ;;  %s577_s25 = int_to_ptr.vmem [resolvable:$true] %s576_s25 }
  0xb6   : > { %s3060_s23 = scalar_lea.hbm %s4320_s12, 32 }
  0xb7   : > { %p3061_p10 = scmp.ne.s32.totalorder %s4320_s12, %s3060_s23  ;;  %p3067_p4 = scmp.lt.u32.totalorder %s3060_s23, %s4320_s12 }
  0xb9   : > { %p3063_p12 = pnand %p3061_p10, %p3659_p11 }
  0xbb   : > { %p3064_p7 = pneg %p3063_p12 }
  0xbd   : > { %p3069_p6 = pnand %p3067_p4, %p3064_p7 }
  0xbf   : > { %3072 = shalt.err (!%p3069_p6)
}
  0xc0   : > { %s3073_s29 = scalar_lea.vmem %s550_s17, 32  ;;  %p3081_p2 = scmp.lt.s32.totalorder %s550_s17, %s550_s17 }
  0xc1   : > { %p3074_p13 = scmp.ne.s32.totalorder %s550_s17, %s3073_s29  ;;  %p3082_p3 = scmp.lt.s32.totalorder %s3073_s29, %s3073_s29 }
  0xc3   : > { %p3076_p0 = pnand %p3074_p13, %p3659_p11  ;;  %p3083_p5 = por %p3082_p3, %p3081_p2 }
  0xc5   : > { %p3077_p1 = pneg %p3076_p0 }
  0xc7   : > { %p3084_p8 = pnand %p3083_p5, %p3077_p1 }
  0xc9   : > { %3087 = shalt.err (!%p3084_p8)
}
  0xca   : > { %s4373_s1 = smov 16   ;;  %s3088_s30 = scalar_lea.hbm %s4322_s14, 16 }
  0xcb   : > { %2736 = dma.hbm_to_vmem [thread:$0]  (!%p3645_p9), %s4320_s12, 32, %s550_s17, [#allocation24], %s4373_s1, %s4373_s1, %s4340_s4  }
  0xcc   : > { %p3089_p10 = scmp.ne.s32.totalorder %s4322_s14, %s3088_s30  ;;  %p3095_p4 = scmp.lt.u32.totalorder %s3088_s30, %s4322_s14 }
  0xce   : > { %p3091_p12 = pnand %p3089_p10, %p3659_p11 }
  0xd0   : > { %p3092_p7 = pneg %p3091_p12 }
  0xd2   : > { %p3097_p6 = pnand %p3095_p4, %p3092_p7 }
  0xd4   : > { %3100 = shalt.err (!%p3097_p6)
}
  0xd5   : > { %s3101_s29 = scalar_lea.vmem %s577_s25, 16  ;;  %s3108_s17 = scalar_lea.vmem %s577_s25, 32 }
  0xd6   : > { %p3102_p13 = scmp.ne.s32.totalorder %s577_s25, %s3101_s29  ;;  %p3109_p2 = scmp.lt.s32.totalorder %s577_s25, %s577_s25 }
  0xd7   : > { %p3110_p3 = scmp.lt.s32.totalorder %s3108_s17, %s3101_s29 }
  0xd8   : > { %p3104_p0 = pnand %p3102_p13, %p3659_p11 }
  0xd9   : > { %p3111_p5 = por %p3110_p3, %p3109_p2 }
  0xda   : > { %p3105_p1 = pneg %p3104_p0 }
  0xdc   : > { %p3112_p8 = pnand %p3111_p5, %p3105_p1 }
  0xde   : > { %3115 = shalt.err (!%p3112_p8)
}
  0xdf   : > { %2742 = dma.hbm_to_vmem [thread:$0]  (!%p3645_p9), %s4322_s14, 16, %s577_s25, [#allocation27]  }
  0xe0   : > { %s3490_s18 = smov [#allocation13]   ;;  %s3491_s30 = smov [#allocation16]  }
  0xe1   : > { %s458_s22 = sshll.u32 %s3490_s18, 4  ;;  %s484_s23 = sshll.u32 %s3491_s30, 4  ;;  %s459_s22 = int_to_ptr.vmem [resolvable:$true] %s458_s22  ;;  %s485_s23 = int_to_ptr.vmem [resolvable:$true] %s484_s23 }
  0xe2   : > { %s4374_s5 = sld [smem:[#allocation54_spill]] }
  0xe8   : > { %s3116_s19 = scalar_lea.hbm %s4374_s5, 1536 }
  0xe9   : > { %p3117_p10 = scmp.ne.s32.totalorder %s4374_s5, %s3116_s19  ;;  %p3123_p4 = scmp.lt.u32.totalorder %s3116_s19, %s4374_s5 }
  0xeb   : > { %p3119_p12 = pnand %p3117_p10, %p3659_p11 }
  0xed   : > { %p3120_p7 = pneg %p3119_p12 }
  0xef   : > { %p3125_p6 = pnand %p3123_p4, %p3120_p7 }
  0xf1   : > { %3128 = shalt.err (!%p3125_p6)
}
  0xf2   : > { %s3129_s25 = scalar_lea.vmem %s459_s22, 1536  ;;  %p3137_p2 = scmp.lt.s32.totalorder %s459_s22, %s459_s22 }
  0xf3   : > { %p3130_p13 = scmp.ne.s32.totalorder %s459_s22, %s3129_s25  ;;  %p3138_p3 = scmp.lt.s32.totalorder %s3129_s25, %s3129_s25 }
  0xf5   : > { %p3132_p0 = pnand %p3130_p13, %p3659_p11  ;;  %p3139_p5 = por %p3138_p3, %p3137_p2 }
  0xf7   : > { %p3133_p1 = pneg %p3132_p0 }
  0xf9   : > { %p3140_p8 = pnand %p3139_p5, %p3133_p1 }
  0xfb   : > { %3143 = shalt.err (!%p3140_p8)
}
  0xfc   : > { %2715 = dma.hbm_to_vmem [thread:$0]  (!%p3645_p9), %s4374_s5, 1536, %s459_s22, [#allocation12], %s4342_s24, %s4342_s24, %s4344_s2  }
  0xfd   : > { %s4375_s7 = sld [smem:[#allocation56_spill]] }
 0x103   : > { %s3144_s27 = scalar_lea.hbm %s4375_s7, 32 }
 0x104   : > { %p3145_p10 = scmp.ne.s32.totalorder %s4375_s7, %s3144_s27  ;;  %p3151_p4 = scmp.lt.u32.totalorder %s3144_s27, %s4375_s7 }
 0x106   : > { %p3147_p12 = pnand %p3145_p10, %p3659_p11 }
 0x108   : > { %p3148_p7 = pneg %p3147_p12 }
 0x10a   : > { %p3153_p6 = pnand %p3151_p4, %p3148_p7 }
 0x10c   : > { %3156 = shalt.err (!%p3153_p6)
}
 0x10d   : > { %s3157_s3 = scalar_lea.vmem %s485_s23, 32  ;;  %p3165_p2 = scmp.lt.s32.totalorder %s485_s23, %s485_s23 }
 0x10e   : > { %p3158_p13 = scmp.ne.s32.totalorder %s485_s23, %s3157_s3  ;;  %p3166_p3 = scmp.lt.s32.totalorder %s3157_s3, %s3157_s3 }
 0x110   : > { %p3160_p0 = pnand %p3158_p13, %p3659_p11  ;;  %p3167_p5 = por %p3166_p3, %p3165_p2 }
 0x112   : > { %p3161_p1 = pneg %p3160_p0 }
 0x114   : > { %p3168_p8 = pnand %p3167_p5, %p3161_p1 }
 0x116   : > { %3171 = shalt.err (!%p3168_p8)
}
 0x117   : > { %s4376_s22 = smov 1   ;;  %s3492_s20 = smov [#allocation19]  }
 0x118   : > { %2721 = dma.hbm_to_vmem [thread:$0]  (!%p3645_p9), %s4375_s7, 32, %s485_s23, [#allocation15], %s4373_s1, %s4373_s1, %s4376_s22  }
 0x119   : > { %s510_s18 = sshll.u32 %s3492_s20, 4  ;;  %s3493_s30 = smov [#allocation22]   ;;  %s511_s18 = int_to_ptr.vmem [resolvable:$true] %s510_s18 }
 0x11a   : > { %s536_s27 = sshll.u32 %s3493_s30, 4  ;;  %s4377_s9 = sld [smem:[#allocation58_spill]]  ;;  %s537_s27 = int_to_ptr.vmem [resolvable:$true] %s536_s27 }
 0x120   : > { %s3172_s29 = scalar_lea.hbm %s4377_s9, 512 }
 0x121   : > { %p3173_p10 = scmp.ne.s32.totalorder %s4377_s9, %s3172_s29  ;;  %p3179_p4 = scmp.lt.u32.totalorder %s3172_s29, %s4377_s9 }
 0x123   : > { %p3175_p12 = pnand %p3173_p10, %p3659_p11 }
 0x125   : > { %p3176_p7 = pneg %p3175_p12 }
 0x127   : > { %p3181_p6 = pnand %p3179_p4, %p3176_p7 }
 0x129   : > { %3184 = shalt.err (!%p3181_p6)
}
 0x12a   : > { %s3185_s23 = scalar_lea.vmem %s511_s18, 512  ;;  %p3193_p2 = scmp.lt.s32.totalorder %s511_s18, %s511_s18 }
 0x12b   : > { %p3186_p13 = scmp.ne.s32.totalorder %s511_s18, %s3185_s23  ;;  %p3194_p3 = scmp.lt.s32.totalorder %s3185_s23, %s3185_s23 }
 0x12d   : > { %p3188_p0 = pnand %p3186_p13, %p3659_p11  ;;  %p3195_p5 = por %p3194_p3, %p3193_p2 }
 0x12f   : > { %p3189_p1 = pneg %p3188_p0 }
 0x131   : > { %p3196_p8 = pnand %p3195_p5, %p3189_p1 }
 0x133   : > { %3199 = shalt.err (!%p3196_p8)
}
 0x134   : > { %s4378_s4 = smov 64   ;;  %s3200_s19 = scalar_lea.hbm %s4319_s11, 32 }
 0x135   : > { %2727 = dma.hbm_to_vmem [thread:$0]  (!%p3645_p9), %s4377_s9, 512, %s511_s18, [#allocation18], %s4378_s4, %s4378_s4, %s4344_s2  }
 0x136   : > { %p3201_p10 = scmp.ne.s32.totalorder %s4319_s11, %s3200_s19  ;;  %p3207_p4 = scmp.lt.u32.totalorder %s3200_s19, %s4319_s11 }
 0x138   : > { %p3203_p12 = pnand %p3201_p10, %p3659_p11 }
 0x13a   : > { %p3204_p7 = pneg %p3203_p12 }
 0x13c   : > { %p3209_p6 = pnand %p3207_p4, %p3204_p7 }
 0x13e   : > { %3212 = shalt.err (!%p3209_p6)
}
 0x13f   : > { %s3213_s23 = scalar_lea.vmem %s537_s27, 32  ;;  %p3221_p2 = scmp.lt.s32.totalorder %s537_s27, %s537_s27 }
 0x140   : > { %p3214_p13 = scmp.ne.s32.totalorder %s537_s27, %s3213_s23  ;;  %p3222_p3 = scmp.lt.s32.totalorder %s3213_s23, %s3213_s23 }
 0x142   : > { %p3216_p0 = pnand %p3214_p13, %p3659_p11  ;;  %p3223_p5 = por %p3222_p3, %p3221_p2 }
 0x144   : > { %p3217_p1 = pneg %p3216_p0 }
 0x146   : > { %p3224_p8 = pnand %p3223_p5, %p3217_p1 }
 0x148   : > { %3227 = shalt.err (!%p3224_p8)
}
 0x149   : > { %2733 = dma.hbm_to_vmem [thread:$0]  (!%p3645_p9), %s4319_s11, 32, %s537_s27, [#allocation21], %s4373_s1, %s4373_s1, %s4376_s22  }
 0x14a   : > { %s3494_s20 = smov [#allocation25]   ;;  %s3495_s0 = smov [#allocation28]  }
 0x14b   : > { %s562_s30 = sshll.u32 %s3494_s20, 4  ;;  %s586_s19 = sshll.u32 %s3495_s0, 4  ;;  %s563_s30 = int_to_ptr.vmem [resolvable:$true] %s562_s30  ;;  %s587_s19 = int_to_ptr.vmem [resolvable:$true] %s586_s19 }
 0x14c   : > { %s3228_s3 = scalar_lea.hbm %s4321_s13, 256 }
 0x14d   : > { %p3229_p10 = scmp.ne.s32.totalorder %s4321_s13, %s3228_s3  ;;  %p3235_p4 = scmp.lt.u32.totalorder %s3228_s3, %s4321_s13 }
 0x14f   : > { %p3231_p12 = pnand %p3229_p10, %p3659_p11 }
 0x151   : > { %p3232_p7 = pneg %p3231_p12 }
 0x153   : > { %p3237_p6 = pnand %p3235_p4, %p3232_p7 }
 0x155   : > { %3240 = shalt.err (!%p3237_p6)
}
 0x156   : > { %s3241_s1 = scalar_lea.vmem %s563_s30, 256  ;;  %p3249_p2 = scmp.lt.s32.totalorder %s563_s30, %s563_s30 }
 0x157   : > { %p3242_p13 = scmp.ne.s32.totalorder %s563_s30, %s3241_s1  ;;  %p3250_p3 = scmp.lt.s32.totalorder %s3241_s1, %s3241_s1 }
 0x159   : > { %p3244_p0 = pnand %p3242_p13, %p3659_p11  ;;  %p3251_p5 = por %p3250_p3, %p3249_p2 }
 0x15b   : > { %p3245_p1 = pneg %p3244_p0 }
 0x15d   : > { %p3252_p8 = pnand %p3251_p5, %p3245_p1 }
 0x15f   : > { %3255 = shalt.err (!%p3252_p8)
}
 0x160   : > { %s4379_s22 = smov 4   ;;  %s3256_s0 = scalar_lea.hbm %s4323_s15, 256 }
 0x161   : > { %2739 = dma.hbm_to_vmem [thread:$0]  (!%p3645_p9), %s4321_s13, 256, %s563_s30, [#allocation24], %s4378_s4, %s4378_s4, %s4379_s22  }
 0x162   : > { %p3257_p10 = scmp.ne.s32.totalorder %s4323_s15, %s3256_s0  ;;  %p3263_p4 = scmp.lt.u32.totalorder %s3256_s0, %s4323_s15 }
 0x164   : > { %p3259_p12 = pnand %p3257_p10, %p3659_p11 }
 0x166   : > { %p3260_p7 = pneg %p3259_p12 }
 0x168   : > { %p3265_p6 = pnand %p3263_p4, %p3260_p7 }
 0x16a   : > { %3268 = shalt.err (!%p3265_p6)
}
 0x16b   : > { %s3269_s23 = scalar_lea.vmem %s587_s19, 256  ;;  %p3277_p2 = scmp.lt.s32.totalorder %s587_s19, %s587_s19 }
 0x16c   : > { %p3270_p13 = scmp.ne.s32.totalorder %s587_s19, %s3269_s23  ;;  %p3278_p3 = scmp.lt.s32.totalorder %s3269_s23, %s3269_s23 }
 0x16e   : > { %p3272_p0 = pnand %p3270_p13, %p3659_p11  ;;  %p3279_p5 = por %p3278_p3, %p3277_p2 }
 0x170   : > { %p3273_p1 = pneg %p3272_p0 }
 0x172   : > { %p3280_p8 = pnand %p3279_p5, %p3273_p1 }
 0x174   : > { %3283 = shalt.err (!%p3280_p8)
}
 0x175   : > { %2745 = dma.hbm_to_vmem [thread:$0]  (!%p3645_p9), %s4323_s15, 256, %s587_s19, [#allocation27], %s4378_s4, %s4378_s4, %s4379_s22  }
 0x176   : > { %s3496_s1 = smov [#allocation29]   ;;  %s3284_s20 = scalar_lea.hbm %s4324_s16, 16 }
 0x177   : > { %s600_s2 = sshll.u32 %s3496_s1, 4  ;;  %p3285_p10 = scmp.ne.s32.totalorder %s4324_s16, %s3284_s20  ;;  %s601_s2 = int_to_ptr.vmem [resolvable:$true] %s600_s2 }
 0x178   : > { %p3291_p4 = scmp.lt.u32.totalorder %s3284_s20, %s4324_s16 }
 0x179   : > { %p3287_p12 = pnand %p3285_p10, %p3659_p11 }
 0x17b   : > { %p3288_p7 = pneg %p3287_p12 }
 0x17d   : > { %p3293_p6 = pnand %p3291_p4, %p3288_p7 }
 0x17f   : > { %3296 = shalt.err (!%p3293_p6)
}
 0x180   : > { %s3297_s19 = scalar_lea.vmem %s601_s2, 16  ;;  %s3304_s25 = scalar_lea.vmem %s601_s2, 32 }
 0x181   : > { %p3298_p13 = scmp.ne.s32.totalorder %s601_s2, %s3297_s19  ;;  %p3305_p2 = scmp.lt.s32.totalorder %s601_s2, %s601_s2 }
 0x182   : > { %p3306_p3 = scmp.lt.s32.totalorder %s3304_s25, %s3297_s19 }
 0x183   : > { %p3300_p0 = pnand %p3298_p13, %p3659_p11 }
 0x184   : > { %p3307_p5 = por %p3306_p3, %p3305_p2 }
 0x185   : > { %p3301_p1 = pneg %p3300_p0 }
 0x187   : > { %p3308_p8 = pnand %p3307_p5, %p3301_p1 }
 0x189   : > { %3311 = shalt.err (!%p3308_p8)
}
 0x18a   : > { %s4380_s18 = sld [smem:[#allocation46_spill]]  ;;  %s4381_s1 = sld [smem:[#allocation45_spill]] }
 0x18b   : > { %s4382_s26 = sld [smem:[#allocation44_spill]]  ;;  %s4383_s27 = sld [smem:[#allocation47_spill]] }
 0x18c   : > { %2748 = dma.hbm_to_vmem [thread:$0]  (!%p3645_p9), %s4324_s16, 16, %s601_s2, [#allocation30]  }
 0x18d   : > { %s2281_s24 = sadd.s32 4294967294, %s3476_s21   ;;  %s3952_s28 = sadd.s32 1, %s3476_s21  }
 0x18e   : > { %s51_s20 = ssub.s32 %s3476_s21, %s3952_s28  ;;  %p62_p12 = scmp.eq.s32.totalorder %s3476_s21, 0 }
 0x18f   : > { %p52_p11 = scmp.eq.s32.totalorder %s51_s20, 0  ;;  %p417_p0 = scmp.eq.s32.totalorder %s2281_s24, 1 }
 0x190   : > { %s54_s0 = sadd.s32 1, %s4380_s18  ;;  %p61_p10 = scmp.ne.s32.totalorder %s4380_s18, %s4381_s1 }
 0x191   : > { %p67_p7 = scmp.ne.s32.totalorder %s4381_s1, %s4382_s26  ;;  %p4385_p6 = scmp.eq.s32.totalorder %s4383_s27, 0 }
 0x192   : > { %s3963_s29 = scalar_select %p52_p11, %s4380_s18, %s54_s0  }
 0x193   : > { %p3965_p4 = por %p62_p12, %p61_p10  ;;  %p3971_p9 = por %p4385_p6, %p67_p7 }
 0x194   : > { %p411_p13 = scmp.eq.s32.totalorder %s4383_s27, 1  ;;  %p2774_p1 = scmp.lt.s32.totalorder %s3476_s21, 2 }
 0x195   : > { %s3978_s3 = sand.u32 1, %s4380_s18   ;;  %p3984_p3 = por %p417_p0, %p67_p7 }
 0x196   : > { %p3980_p2 = por %p411_p13, %p61_p10  ;;  %s2298_s23 = sshll.u32 %s3978_s3, 3 }
 0x197   : > { %s4388_s25 = scalar_select %p3984_p3, 1, 0 }
 0x198   : > { %s4387_s19 = scalar_select %p3980_p2, 1, 0 }
 0x199   : > { %s2397_s30 = sshll.u32 %s3476_s21, 7  ;;  %s4389_s27 = sld [smem:[#allocation50_spill]] }
 0x19a   : > { %s615_s18 = scalar_lea.vmem [#allocation5], %s2298_s23  ;;  %p3999_p5 = pnand %p2774_p1, %p3965_p4 }
 0x19b   : > { %s622_s20 = sshll.u32 %s615_s18, 4  ;;  %s2301_s6 = sshll.u32 %s3978_s3, 4  ;;  %s3995_s20 = int_to_ptr.vmem [resolvable:$true] %s622_s20 }
 0x19c   : > { %s612_s1 = scalar_lea.sflag [#allocation6], %s3978_s3  ;;  %p3314_p11 = pneg %p3999_p5 }
 0x19f   : > { %s3993_s24 = scalar_lea.hbm %s4389_s27, %s2397_s30  ;;  %s3317_s17 = scalar_lea.hbm %s4389_s27, 256 }
 0x1a0   : > { %s3312_s30 = scalar_lea.hbm %s3993_s24, 128  ;;  %p3318_p7 = scmp.lt.u32.totalorder %s3993_s24, %s4389_s27 }
 0x1a1   : > { %p3313_p8 = scmp.ne.s32.totalorder %s3993_s24, %s3312_s30  ;;  %p3319_p4 = scmp.lt.u32.totalorder %s3317_s17, %s3312_s30 }
 0x1a2   : > { %p3321_p13 = scmp.lt.u32.totalorder %s3312_s30, %s3993_s24 }
 0x1a3   : > { %p3315_p10 = pnand %p3314_p11, %p3313_p8  ;;  %p3320_p6 = por %p3319_p4, %p3318_p7 }
 0x1a5   : > { %p3316_p12 = pneg %p3315_p10  ;;  %p3322_p0 = por %p3321_p13, %p3320_p6 }
 0x1a7   : > { %p3323_p1 = pnand %p3322_p0, %p3316_p12 }
 0x1a9   : > { %3326 = shalt.err (!%p3323_p1)
}
 0x1aa   : > { %s3327_s5 = scalar_lea.vmem %s3995_s20, 128  ;;  %s3497_s23 = smov [#allocation5]  }
 0x1ab   : > { %p3328_p8 = scmp.ne.s32.totalorder %s3995_s20, %s3327_s5  ;;  %s3332_s26 = sshll.u32 %s3497_s23, 4  ;;  %s3333_s26 = int_to_ptr.vmem [resolvable:$false] %s3332_s26 }
 0x1ac   : > { %s3334_s7 = scalar_lea.vmem %s3333_s26, 256  ;;  %p3335_p2 = scmp.lt.s32.totalorder %s3995_s20, %s3333_s26 }
 0x1ad   : > { %p3330_p10 = pnand %p3328_p8, %p3314_p11  ;;  %p3336_p7 = scmp.lt.s32.totalorder %s3334_s7, %s3327_s5 }
 0x1af   : > { %p3331_p3 = pneg %p3330_p10  ;;  %p3337_p4 = por %p3336_p7, %p3335_p2 }
 0x1b1   : > { %p3338_p6 = pnand %p3337_p4, %p3331_p3 }
 0x1b3   : > { %3341 = shalt.err (!%p3338_p6)
}
 0x1b4   : > { %2752 = dma.hbm_to_vmem [thread:$0]  (!%p3999_p5), %s3993_s24, 128, %s3995_s20, %s612_s1, %s4378_s4, %s4378_s4, %s4379_s22  }
 0x1b5   : > { %s2398_s30 = sshll.u32 %s3476_s21, 8  ;;  %s4391_s18 = sld [smem:[#allocation51_spill]] }
 0x1b6   : > { %s636_s26 = scalar_lea.vmem [#allocation8], %s2301_s6  ;;  %s4392_s8 = sand.u32 1, %s3476_s21  }
 0x1b7   : > { %s643_s7 = sshll.u32 %s636_s26, 4  ;;  %s4048_s9 = scalar_lea.sflag [#allocation9], %s4392_s8  ;;  %s4044_s7 = int_to_ptr.vmem [resolvable:$true] %s643_s7 }
 0x1bb   : > { %s4040_s23 = scalar_lea.hbm %s4391_s18, %s2398_s30  ;;  %s3347_s3 = scalar_lea.hbm %s4391_s18, 512 }
 0x1bc   : > { %s3342_s10 = scalar_lea.hbm %s4040_s23, 256  ;;  %p3348_p13 = scmp.lt.u32.totalorder %s4040_s23, %s4391_s18 }
 0x1bd   : > { %p3343_p2 = scmp.ne.s32.totalorder %s4040_s23, %s3342_s10  ;;  %p3349_p0 = scmp.lt.u32.totalorder %s3347_s3, %s3342_s10 }
 0x1be   : > { %p3351_p8 = scmp.lt.u32.totalorder %s3342_s10, %s4040_s23 }
 0x1bf   : > { %p3345_p3 = pnand %p3343_p2, %p3314_p11  ;;  %p3350_p1 = por %p3349_p0, %p3348_p13 }
 0x1c1   : > { %p3346_p12 = pneg %p3345_p3  ;;  %p3352_p10 = por %p3351_p8, %p3350_p1 }
 0x1c3   : > { %p3353_p7 = pnand %p3352_p10, %p3346_p12 }
 0x1c5   : > { %3356 = shalt.err (!%p3353_p7)
}
 0x1c6   : > { %s3357_s6 = scalar_lea.vmem %s4044_s7, 256  ;;  %s3498_s8 = smov [#allocation8]  }
 0x1c7   : > { %p3358_p4 = scmp.ne.s32.totalorder %s4044_s7, %s3357_s6  ;;  %s3362_s1 = sshll.u32 %s3498_s8, 4  ;;  %s3363_s1 = int_to_ptr.vmem [resolvable:$false] %s3362_s1 }
 0x1c8   : > { %s3364_s30 = scalar_lea.vmem %s3363_s1, 512  ;;  %p3365_p3 = scmp.lt.s32.totalorder %s4044_s7, %s3363_s1 }
 0x1c9   : > { %p3360_p6 = pnand %p3358_p4, %p3314_p11  ;;  %p3366_p13 = scmp.lt.s32.totalorder %s3364_s30, %s3357_s6 }
 0x1cb   : > { %p3361_p2 = pneg %p3360_p6  ;;  %p3367_p0 = por %p3366_p13, %p3365_p3 }
 0x1cd   : > { %p3368_p1 = pnand %p3367_p0, %p3361_p2 }
 0x1cf   : > { %3371 = shalt.err (!%p3368_p1)
}
 0x1d0   : > { %s3499_s10 = smov 128   ;;  %s3500_s17 = smov 8  }
 0x1d1   : > { %2755 = dma.hbm_to_vmem [thread:$0]  (!%p3999_p5), %s4040_s23, 256, %s4044_s7, %s4048_s9, %s3499_s10, %s3499_s10, %s3500_s17  }
 0x1d2   : > { %s4393_s5 = sld [smem:[#allocation48_spill]] }
 0x1d8   : > { %p4394_p11 = scmp.ne.s32.totalorder %s4393_s5, 0 }
 0x1d9   : > { %s4395_s26 = sld [smem:[#allocation45_spill]] (!%p4394_p11) }
 0x1da   : > { %655 = sbr.rel (%p4394_p11) target bundleno = 1990 (0x7c6), region = 84 }
 0x1df   : > { %s4077_s4 = sand.u32 (!%p4394_p11), 1, %s4395_s26  }
 0x1e0   : > { %s2305_s22 = sshll.u32 (!%p4394_p11), %s4077_s4, 3  ;;  %s658_s3 = scalar_lea.sflag (!%p4394_p11), [#allocation6], %s4077_s4 }
 0x1e1   : > { %s4081_s24 = scalar_lea.vmem [#allocation5], %s2305_s22 }
 0x1e2   : > { %3419 = dma.done.wait (%p3971_p9), %s658_s3, 128  }
 0x1e3   : > { %3421 = vsyncadd (%p3971_p9), %s658_s3, 4294967168  ;;  %s4396_s0 = sld [smem:[#allocation47_spill]]  ;;  %s2306_s23 = sshll.u32 %s4077_s4, 4 }
 0x1e4   : > { %s4089_s20 = scalar_lea.vmem [#allocation8], %s2306_s23 }
 0x1e9   : > { %s666_s9 = sand.u32 1, %s4396_s0  }
 0x1ea   : > { %s667_s7 = scalar_lea.sflag [#allocation9], %s666_s9 }
 0x1eb   : > { %3423 = dma.done.wait (%p3971_p9), %s667_s7, 256  }
 0x1ec   : > { %3425 = vsyncadd (%p3971_p9), %s667_s7, 4294967040  ;;  %p4397_p5 = scmp.eq.s32.totalorder %s4396_s0, 0 }
 0x1ee   : > { %3427 = dma.done.wait (%p4397_p5), [#allocation9], 64   ;;  %p4398_p12 = pmov %p4397_p5 }
 0x1ef   : > { %p4399_p8 = pmov %p4397_p5 }
 0x1f0   : > { %3429 = vsyncadd (%p4398_p12), [#allocation9], 4294967232 }
 0x1f1   : > { %3431 = dma.done.wait (%p4399_p8), [#allocation12], 1552   ;;  %p4400_p10 = pmov %p4397_p5 }
 0x1f2   : > { %p4401_p7 = pmov %p4397_p5 }
 0x1f3   : > { %3433 = vsyncadd (%p4400_p10), [#allocation12], 4294965744 }
 0x1f4   : > { %3435 = dma.done.wait (%p4401_p7), [#allocation15], 1568   ;;  %p4402_p4 = pmov %p4397_p5 }
 0x1f6   : > { %3437 = vsyncadd (%p4402_p4), [#allocation15], 4294965728  ;;  %p4403_p9 = pmov %p4402_p4 }
 0x1f7   : > { %p4404_p6 = pmov %p4402_p4 }
 0x1f8   : > { %3439 = dma.done.wait (%p4403_p9), [#allocation18], 544  }
 0x1f9   : > { %3441 = vsyncadd (%p4404_p6), [#allocation18], 4294966752  ;;  %p4405_p2 = pmov %p4402_p4 }
 0x1fb   : > { %3443 = dma.done.wait (%p4405_p2), [#allocation21], 544   ;;  %p4406_p3 = pmov %p4405_p2 }
 0x1fc   : > { %p4407_p13 = pmov %p4405_p2 }
 0x1fd   : > { %3445 = vsyncadd (%p4406_p3), [#allocation21], 4294966752 }
 0x1fe   : > { %3447 = dma.done.wait (%p4407_p13), [#allocation24], 288   ;;  %p4408_p0 = pmov %p4405_p2 }
 0x200   : > { %3449 = vsyncadd (%p4408_p0), [#allocation24], 4294967008  ;;  %p4409_p1 = pmov %p4408_p0 }
 0x201   : > { %p4410_p11 = pmov %p4408_p0 }
 0x202   : > { %3451 = dma.done.wait (%p4409_p1), [#allocation27], 272  }
 0x203   : > { %3453 = vsyncadd (%p4410_p11), [#allocation27], 4294967024  ;;  %p4411_p5 = pmov %p4408_p0 }
 0x204   : > { %p4412_p12 = pmov %p4408_p0 }
 0x205   : > { %3455 = dma.done.wait (%p4411_p5), [#allocation30], 16  }
 0x206   : > { %3457 = vsyncadd (%p4412_p12), [#allocation30], 4294967280  ;;  %v3501_v0 = vmov 0.0   ;;  %vm3502_vm0 = vmmov 0   ;;  %vm792_vm1 = vcmask 261120   ;;  %vm816_vm2 = vcmask 1043456  }
 0x207   : > { %2452 = vmatprep.subr.bf16.mxu0 %v3501_v0  ;;  %2454 = vmatprep.mubr.msk.bf16.mxu0 %vm3502_vm0, %v3501_v0  ;;  %794 = vst.msk [vmem:[#allocation2 + $0x8] sm:$0xff] %vm792_vm1, %v3501_v0  ;;  %793 = vst.msk [vmem:[#allocation2] sm:$0xff] %vm792_vm1, %v3501_v0  ;;  %v799_v1 = vld [vmem:[#allocation10] sm:$0xf]  ;;  %v2847_v3 = vld [vmem:[%s4081_s24] sm:$0xff]   ;;  %vm812_vm3 = vcmask 64512   ;;  %v782_v8 = vlaneseq }
 0x208   : > { %795 = vst.msk [vmem:[#allocation2 + $0x10] sm:$0xff] %vm792_vm1, %v3501_v0  ;;  %796 = vst.msk [vmem:[#allocation2 + $0x18] sm:$0xff] %vm792_vm1, %v3501_v0  ;;  %2458 = vmatprep.subr.bf16.mxu1 %v3501_v0  ;;  %2462 = vmatprep.mubr.msk.bf16.mxu1 %vm3502_vm0, %v3501_v0  ;;  %v818_v2 = vsel %vm816_vm2, %v799_v1, 0  ;;  %v2848_v4 = vld [vmem:[#allocation14] sm:$0xff]   ;;  %v2850_v6 = vld [vmem:[#allocation14 + $0x8] sm:$0xff]   ;;  %s781_s2 = sld [smem:[#allocation4 + %s4396_s0]] }
 0x209   : > { %2453 = vmatpush3.bf16.msra.mxu0 %v818_v2  ;;  %v2849_v5 = vld [vmem:[#allocation13] sm:$0xff]   ;;  %v2851_v7 = vld [vmem:[#allocation13 + $0x8] sm:$0xff]   ;;  %v783_v9 = vshrl.u32 %v782_v8, 7  ;;  %v2323_v12 = vld [vmem:[#allocation11] ss:$0 sm:$0xff]  ;;  %s2642_s6 = smul.u32 48, %s4077_s4 }
 0x20a   : > { %2466 = vmatprep.subr.bf16.mxu0 %v3501_v0  ;;  %2459 = vmatpush3.bf16.msra.mxu1 %v2849_v5  ;;  %v2852_v23 = vld [vmem:[#allocation14 + $0x10] sm:$0xff]   ;;  %v2854_v28 = vld [vmem:[#allocation14 + $0x18] sm:$0xff]   ;;  %v2856_v32 = vld [vmem:[#allocation14 + $0x20] sm:$0xff]   ;;  %vm2029_vm6 = vcmask 130048   ;;  %s2643_s30 = smul.u32 768, %s4396_s0  ;;  %s4413_s5 = sld [smem:[#allocation60_spill]] }
 0x20b   : > { %2460 = vmatprep.subr.bf16.mxu1 %v3501_v0  ;;  %v784_v11 = vadd.s32 8, %v783_v9  ;;  %v2853_v26 = vld [vmem:[#allocation13 + $0x10] sm:$0xff]   ;;  %v2855_v29 = vld [vmem:[#allocation13 + $0x18] sm:$0xff]   ;;  %v2857_v33 = vld [vmem:[#allocation13 + $0x20] sm:$0xff]   ;;  %s779_s8 = scalar_lea.vmem [#allocation31], %s2642_s6  ;;  %s2039_s22 = scalar_lea.sflag [#allocation7], %s4077_s4 }
 0x20c   : > { %2455 = vmatmul.mubr.msk.bf16.vlgmr.msra.gmra.mrb[0].mxu0 %vm812_vm3, %v2847_v3  ;;  %v2858_v35 = vld [vmem:[#allocation14 + $0x28] sm:$0xff]   ;;  %v2330_v44 = vld [vmem:[#allocation17] ss:$0 sm:$0xff]  ;;  %v2326_v57 = vld [vmem:[#allocation16] ss:$0 sm:$0xff]  ;;  %s2052_s1 = sshll.u32 %s779_s8, 4  ;;  %s4257_s1 = int_to_ptr.vmem [resolvable:$true] %s2052_s1 }
 0x20d   : > { %2470 = vmatprep.mubr.msk.bf16.mxu0 %vm3502_vm0, %v3501_v0  ;;  %2467 = vmatpush3.bf16.msra.mxu0 %v2848_v4  ;;  %v2859_v36 = vld [vmem:[#allocation13 + $0x28] sm:$0xff]   ;;  %v2864_v8 = vld [vmem:[#allocation14 + $0x30] sm:$0xff]   ;;  %s3372_s3 = scalar_lea.vmem %s4257_s1, 768  ;;  %p4414_p10 = scmp.ne.s32.totalorder %s4387_s19, 0 }
 0x20e   : > { %2468 = vmatprep.subr.bf16.mxu0 %v3501_v0  ;;  %2461 = vmatpush3.bf16.msra.mxu1 %v2851_v7  ;;  %v785_v10 = vstv %s781_s2  ;;  %v2860_v40 = vld [vmem:[#allocation19] sm:$0xff]   ;;  %v2862_v42 = vld [vmem:[#allocation19 + $0x8] sm:$0xff]   ;;  %p3373_p8 = scmp.ne.s32.totalorder %s4257_s1, %s3372_s3  ;;  %s3503_s24 = smov [#allocation31]  }
 0x20f   : > { %2474 = vmatprep.subr.bf16.mxu1 %v3501_v0  ;;  %vm786_vm4 = vcmp.lt.s32.totalorder %v783_v9, %v785_v10  ;;  %vm787_vm5 = vcmp.lt.s32.totalorder %v784_v11, %v785_v10  ;;  %v2861_v41 = vld [vmem:[#allocation20] sm:$0xff]   ;;  %v2863_v43 = vld [vmem:[#allocation20 + $0x8] sm:$0xff]   ;;  %v2866_v10 = vld [vmem:[#allocation14 + $0x38] sm:$0xff]   ;;  %s3376_s0 = sshll.u32 %s3503_s24, 4  ;;  %s3377_s0 = int_to_ptr.vmem [resolvable:$false] %s3376_s0 }
 0x210   : > { %v4151_v13 = vsel %vm786_vm4, 1.0, %v3501_v0  ;;  %v4154_v17 = vsel %vm787_vm5, 1.0, %v3501_v0  ;;  %v2865_v9 = vld [vmem:[#allocation13 + $0x30] sm:$0xff]   ;;  %v2867_v11 = vld [vmem:[#allocation13 + $0x38] sm:$0xff]   ;;  %s4263_s26 = scalar_lea.hbm %s4413_s5, %s2643_s30  ;;  %p3374_p7 = pnand %p3373_p8, %p4414_p10 }
 0x211   : > { %2469 = vmatpush3.bf16.msra.mxu0 %v2850_v6  ;;  %s3378_s9 = scalar_lea.vmem %s3377_s0, 1536  ;;  %p3379_p9 = scmp.lt.s32.totalorder %s4257_s1, %s3377_s0 }
 0x212   : > { %2482 = vmatprep.subr.bf16.mxu0 %v3501_v0  ;;  %p3375_p4 = pneg %p3374_p7  ;;  %p3380_p6 = scmp.lt.s32.totalorder %s3378_s9, %s3372_s3 }
 0x214   : > { %p3381_p2 = por %p3380_p6, %p3379_p9 }
 0x216   : > { %p3382_p3 = pnand %p3381_p2, %p3375_p4 }
 0x2df   : > { %v854_v14 = vpop.f32.mrb[0].mxu0 }
 0x2e0   : > { %v855_v15 = vadd.f32 %v2323_v12, %v854_v14  ;;  %v2456_v16 = vpop.f32.mrb[1].mxu0 }
 0x2e1   : > { %v857_v18 = vpop.f32.mrb[2].mxu0 }
 0x2e2   : > { %v4157_v19 = vmul.f32 %v4151_v13, %v855_v15  ;;  %v858_v20 = vadd.f32 %v2323_v12, %v857_v18  ;;  %v2457_v21 = vpop.f32.mrb[3].mxu0  ;;  %v2352_v12 = vld [vmem:[#allocation22] ss:$0 sm:$0xff] }
 0x2e4   : > { %863 = vst.msk [vmem:[#allocation2 + $0x8] sm:$0xff] %vm792_vm1, %v4157_v19  ;;  %v4162_v22 = vmul.f32 %v4154_v17, %v858_v20 }
 0x2e6   : > { %864 = vst.msk [vmem:[#allocation2 + $0x10] sm:$0xff] %vm792_vm1, %v4162_v22 }
 0x2eb   : > { %v865_v24 = vld [vmem:[#allocation2 + $0x7] sm:$0xff] }
 0x2ec   : > { %v999_v31 = vld [vmem:[#allocation2 + $0x8] sm:$0xff] }
 0x2ed   : > { %v866_v25 = vld [vmem:[#allocation2 + $0xf] sm:$0xff] }
 0x2ee   : > { %v867_v27 = vpack.c.bf16 %v866_v25, %v865_v24  ;;  %v1000_v30 = vld [vmem:[#allocation2 + $0x10] sm:$0xff] }
 0x2ef   : > { %v1001_v34 = vpack.c.bf16 %v1000_v30, %v999_v31  ;;  %v1125_v37 = vld [vmem:[#allocation2 + $0x9] sm:$0xff]  ;;  %v1126_v38 = vld [vmem:[#allocation2 + $0x11] sm:$0xff] }
 0x2f0   : > { %2463 = vmatmul.mubr.msk.bf16.vlgmr.msra.gmra.mrb[0].mxu1 %vm792_vm1, %v867_v27  ;;  %2471 = vmatmul.mubr.msk.bf16.vlgmr.msra.gmra.mrb[4].mxu0 %vm792_vm1, %v867_v27  ;;  %v1127_v39 = vpack.c.bf16 %v1126_v38, %v1125_v37  ;;  %v2868_v27 = vld [vmem:[#allocation14 + $0x40] sm:$0xff]   ;;  %v2874_v37 = vld [vmem:[#allocation14 + $0x58] sm:$0xff]  }
 0x2f1   : > { %2483 = vmatpush3.bf16.msra.mxu0 %v2852_v23  ;;  %2475 = vmatpush3.bf16.msra.mxu1 %v2853_v26  ;;  %v2869_v30 = vld [vmem:[#allocation13 + $0x40] sm:$0xff]   ;;  %v2875_v38 = vld [vmem:[#allocation13 + $0x58] sm:$0xff]  }
 0x2f2   : > { %2484 = vmatprep.subr.bf16.mxu0 %v3501_v0  ;;  %2476 = vmatprep.subr.bf16.mxu1 %v3501_v0 }
 0x2f3   : > { %2478 = vmatprep.mubr.msk.bf16.mxu1 %vm3502_vm0, %v3501_v0  ;;  %2486 = vmatprep.mubr.msk.bf16.mxu0 %vm3502_vm0, %v3501_v0 }
 0x2f5   : > { %2485 = vmatpush3.bf16.msra.mxu0 %v2854_v28  ;;  %2477 = vmatpush3.bf16.msra.mxu1 %v2855_v29 }
 0x2f6   : > { %2498 = vmatprep.subr.bf16.mxu0 %v3501_v0  ;;  %2490 = vmatprep.subr.bf16.mxu1 %v3501_v0 }
 0x2fc   : > { %2479 = vmatmul.mubr.msk.bf16.vlgmr.msra.gmra.mrb[0].mxu1 %vm792_vm1, %v1001_v34  ;;  %2487 = vmatmul.mubr.msk.bf16.vlgmr.msra.gmra.mrb[4].mxu0 %vm792_vm1, %v1001_v34  ;;  %v2872_v34 = vld [vmem:[#allocation14 + $0x50] sm:$0xff]  }
 0x2fd   : > { %2499 = vmatpush3.bf16.msra.mxu0 %v2856_v32  ;;  %2491 = vmatpush3.bf16.msra.mxu1 %v2857_v33  ;;  %v2871_v32 = vld [vmem:[#allocation13 + $0x48] sm:$0xff]  }
 0x2fe   : > { %2500 = vmatprep.subr.bf16.mxu0 %v3501_v0  ;;  %2492 = vmatprep.subr.bf16.mxu1 %v3501_v0 }
 0x2ff   : > { %2494 = vmatprep.mubr.msk.bf16.mxu1 %vm3502_vm0, %v3501_v0  ;;  %2502 = vmatprep.mubr.msk.bf16.mxu0 %vm3502_vm0, %v3501_v0 }
 0x301   : > { %2501 = vmatpush3.bf16.msra.mxu0 %v2858_v35  ;;  %2493 = vmatpush3.bf16.msra.mxu1 %v2859_v36  ;;  %v2873_v35 = vld [vmem:[#allocation13 + $0x50] sm:$0xff]  }
 0x302   : > { %2514 = vmatprep.subr.bf16.mxu0 %v3501_v0  ;;  %2506 = vmatprep.subr.bf16.mxu1 %v3501_v0 }
 0x308   : > { %2495 = vmatmul.mubr.msk.bf16.vlgmr.msra.gmra.mrb[0].mxu1 %vm792_vm1, %v1127_v39  ;;  %2503 = vmatmul.mubr.msk.bf16.vlgmr.msra.gmra.mrb[4].mxu0 %vm792_vm1, %v1127_v39 }
 0x309   : > { %2510 = vmatprep.mubr.msk.bf16.mxu1 %vm3502_vm0, %v3501_v0  ;;  %2518 = vmatprep.mubr.msk.bf16.mxu0 %vm3502_vm0, %v3501_v0 }
 0x30a   : > { %2515 = vmatpush3.bf16.msra.mxu0 %v2860_v40  ;;  %2507 = vmatpush3.bf16.msra.mxu1 %v2861_v41 }
 0x30b   : > { %2516 = vmatprep.subr.bf16.mxu0 %v3501_v0  ;;  %2508 = vmatprep.subr.bf16.mxu1 %v3501_v0 }
 0x30e   : > { %2517 = vmatpush3.bf16.msra.mxu0 %v2862_v42  ;;  %2509 = vmatpush3.bf16.msra.mxu1 %v2863_v43  ;;  %v2876_v42 = vld [vmem:[#allocation20 + $0x10] sm:$0xff]   ;;  %v2877_v43 = vld [vmem:[#allocation20 + $0x18] sm:$0xff]  }
 0x30f   : > { %2530 = vmatprep.subr.bf16.mxu0 %v3501_v0  ;;  %2522 = vmatprep.subr.bf16.mxu1 %v3501_v0 }
 0x3db   : > { %v1182_v45 = vpop.f32.mrb[0].mxu1  ;;  %v1242_v46 = vpop.f32.mrb[4].mxu0 }
 0x3dc   : > { %v2596_v47 = vadd.f32 %v2330_v44, %v1242_v46  ;;  %v2496_v48 = vpop.f32.mrb[1].mxu1  ;;  %v2504_v49 = vpop.f32.mrb[5].mxu0  ;;  %v2594_v58 = vadd.f32 %v2326_v57, %v1182_v45 }
 0x3dd   : > { %v1185_v50 = vpop.f32.mrb[2].mxu1  ;;  %v1245_v51 = vpop.f32.mrb[6].mxu0 }
 0x3de   : > { %v2346_v52 = vmul.f32 -1.442695, %v2596_v47  ;;  %v2597_v53 = vadd.f32 %v2330_v44, %v1245_v51  ;;  %v2497_v54 = vpop.f32.mrb[3].mxu1  ;;  %v2505_v55 = vpop.f32.mrb[7].mxu0  ;;  %v2595_v60 = vadd.f32 %v2326_v57, %v1185_v50  ;;  %v2360_v44 = vld [vmem:[#allocation17 + $0x1] ss:$0 sm:$0xff] }
 0x3df   : > { %v2356_v57 = vld [vmem:[#allocation16 + $0x1] ss:$0 sm:$0xff] }
 0x3e0   : > { %2882 = vpow2.f32 %v2346_v52  ;;  %v2347_v56 = vmul.f32 -1.442695, %v2597_v53 }
 0x3e2   : > { %2884 = vpow2.f32 %v2347_v56 }
 0x3e3   : > { %2886 = vtanh.f32 %v2594_v58 }
 0x3ea   : > { %v2883_v59 = vpop.eup %2882 }
 0x3eb   : > { %v1259_v61 = vadd.f32 1.0, %v2883_v59 }
 0x3ec   : > { %v2885_v62 = vpop.eup %2884 }
 0x3ed   : > { %2888 = vrcp.f32 %v1259_v61  ;;  %v1260_v63 = vadd.f32 1.0, %v2885_v62  ;;  %v2887_v1 = vpop.eup %2886 }
 0x3ee   : > { %2890 = vtanh.f32 %v2595_v60 }
 0x3ef   : > { %2892 = vrcp.f32 %v1260_v63 }
 0x3f7   : > { %v2889_v2 = vpop.eup %2888 }
 0x3f8   : > { %v2891_v3 = vpop.eup %2890  ;;  %v1265_v4 = vmul.f32 %v2889_v2, %v2887_v1 }
 0x3f9   : > { %v2893_v5 = vpop.eup %2892 }
 0x3fa   : > { %v1266_v6 = vmul.f32 %v2893_v5, %v2891_v3 }
 0x3fc   : > { %v1267_v7 = vpack.c.bf16 %v1266_v6, %v1265_v4 }
 0x3fe   : > { %2511 = vmatmul.mubr.msk.bf16.vlgmr.msra.gmra.mrb[4].mxu1 %vm792_vm1, %v1267_v7  ;;  %2519 = vmatmul.mubr.msk.bf16.vlgmr.msra.gmra.mrb[8].mxu0 %vm792_vm1, %v1267_v7 }
 0x3ff   : > { %2526 = vmatprep.mubr.msk.bf16.mxu1 %vm3502_vm0, %v3501_v0  ;;  %2534 = vmatprep.mubr.msk.bf16.mxu0 %vm3502_vm0, %v3501_v0 }
 0x400   : > { %2531 = vmatpush3.bf16.msra.mxu0 %v2864_v8  ;;  %2523 = vmatpush3.bf16.msra.mxu1 %v2865_v9  ;;  %v2878_v8 = vld [vmem:[#allocation28] sm:$0xff]   ;;  %v2879_v9 = vld [vmem:[#allocation25] sm:$0xff]  }
 0x401   : > { %2532 = vmatprep.subr.bf16.mxu0 %v3501_v0  ;;  %2524 = vmatprep.subr.bf16.mxu1 %v3501_v0 }
 0x404   : > { %2533 = vmatpush3.bf16.msra.mxu0 %v2866_v10  ;;  %2525 = vmatpush3.bf16.msra.mxu1 %v2867_v11  ;;  %v2880_v10 = vld [vmem:[#allocation28 + $0x8] sm:$0xff]   ;;  %v2881_v11 = vld [vmem:[#allocation25 + $0x8] sm:$0xff]  }
 0x405   : > { %2546 = vmatprep.subr.bf16.mxu0 %v3501_v0  ;;  %2538 = vmatprep.subr.bf16.mxu1 %v3501_v0 }
 0x4d1   : > { %v1394_v14 = vpop.f32.mrb[8].mxu0 }
 0x4d2   : > { %v1395_v15 = vadd.f32 %v2352_v12, %v1394_v14  ;;  %v2520_v16 = vpop.f32.mrb[9].mxu0  ;;  %v2378_v14 = vld [vmem:[#allocation23 + $0x1] ss:$0 sm:$0xff] }
 0x4d3   : > { %v1397_v18 = vpop.f32.mrb[10].mxu0 }
 0x4d4   : > { %v1401_v20 = vadd.f32 %v1395_v15, %v4157_v19  ;;  %v1398_v21 = vadd.f32 %v2352_v12, %v1397_v18  ;;  %v2521_v23 = vpop.f32.mrb[11].mxu0  ;;  %v2870_v19 = vld [vmem:[#allocation14 + $0x48] sm:$0xff]   ;;  %v2348_v12 = vld [vmem:[#allocation23] ss:$0 sm:$0xff] }
 0x4d5   : > { %v2598_v15 = vadd.f32 %v2378_v14, %v2348_v12 }
 0x4d6   : > { %v1403_v24 = vmul.f32 %v4151_v13, %v1401_v20  ;;  %v1402_v25 = vadd.f32 %v1398_v21, %v4162_v22 }
 0x4d8   : > { %1405 = vst.msk [vmem:[#allocation2 + $0x8] sm:$0xff] %vm792_vm1, %v1403_v24  ;;  %v1404_v26 = vmul.f32 %v4154_v17, %v1402_v25 }
 0x4da   : > { %1406 = vst.msk [vmem:[#allocation2 + $0x10] sm:$0xff] %vm792_vm1, %v1404_v26 }
 0x4df   : > { %v1407_v28 = vld [vmem:[#allocation2 + $0x6] sm:$0xff] }
 0x4e0   : > { %v1545_v33 = vld [vmem:[#allocation2 + $0x8] sm:$0xff] }
 0x4e1   : > { %v1408_v29 = vld [vmem:[#allocation2 + $0xe] sm:$0xff] }
 0x4e2   : > { %v1409_v31 = vpack.c.bf16 %v1408_v29, %v1407_v28  ;;  %v1546_v22 = vld [vmem:[#allocation2 + $0x10] sm:$0xff]  ;;  %v2386_v28 = vld [vmem:[#allocation29] ss:$0 sm:$0xff] }
 0x4e3   : > { %v1547_v36 = vpack.c.bf16 %v1546_v22, %v1545_v33  ;;  %v1671_v39 = vld [vmem:[#allocation2 + $0xa] sm:$0xff]  ;;  %v1672_v40 = vld [vmem:[#allocation2 + $0x12] sm:$0xff] }
 0x4e4   : > { %2527 = vmatmul.mubr.msk.bf16.vlgmr.msra.gmra.mrb[8].mxu1 %vm792_vm1, %v1409_v31  ;;  %2535 = vmatmul.mubr.msk.bf16.vlgmr.msra.gmra.mrb[12].mxu0 %vm792_vm1, %v1409_v31  ;;  %v1673_v41 = vpack.c.bf16 %v1672_v40, %v1671_v39  ;;  %v2019_v39 = vld [vmem:[%s4089_s20] sm:$0xff] }
 0x4e5   : > { %2547 = vmatpush3.bf16.msra.mxu0 %v2868_v27  ;;  %2539 = vmatpush3.bf16.msra.mxu1 %v2869_v30 }
 0x4e6   : > { %2548 = vmatprep.subr.bf16.mxu0 %v3501_v0  ;;  %2540 = vmatprep.subr.bf16.mxu1 %v3501_v0 }
 0x4e7   : > { %2542 = vmatprep.mubr.msk.bf16.mxu1 %vm3502_vm0, %v3501_v0  ;;  %2550 = vmatprep.mubr.msk.bf16.mxu0 %vm3502_vm0, %v3501_v0 }
 0x4e9   : > { %2549 = vmatpush3.bf16.msra.mxu0 %v2870_v19  ;;  %2541 = vmatpush3.bf16.msra.mxu1 %v2871_v32 }
 0x4ea   : > { %2562 = vmatprep.subr.bf16.mxu0 %v3501_v0  ;;  %2554 = vmatprep.subr.bf16.mxu1 %v3501_v0 }
 0x4f0   : > { %2543 = vmatmul.mubr.msk.bf16.vlgmr.msra.gmra.mrb[8].mxu1 %vm792_vm1, %v1547_v36  ;;  %2551 = vmatmul.mubr.msk.bf16.vlgmr.msra.gmra.mrb[12].mxu0 %vm792_vm1, %v1547_v36 }
 0x4f1   : > { %2563 = vmatpush3.bf16.msra.mxu0 %v2872_v34  ;;  %2555 = vmatpush3.bf16.msra.mxu1 %v2873_v35 }
 0x4f2   : > { %2564 = vmatprep.subr.bf16.mxu0 %v3501_v0  ;;  %2556 = vmatprep.subr.bf16.mxu1 %v3501_v0 }
 0x4f3   : > { %2558 = vmatprep.mubr.msk.bf16.mxu1 %vm3502_vm0, %v3501_v0  ;;  %2566 = vmatprep.mubr.msk.bf16.mxu0 %vm3502_vm0, %v3501_v0 }
 0x4f5   : > { %2565 = vmatpush3.bf16.msra.mxu0 %v2874_v37  ;;  %2557 = vmatpush3.bf16.msra.mxu1 %v2875_v38 }
 0x4f6   : > { %2570 = vmatprep.subr.bf16.mxu1 %v3501_v0  ;;  %2578 = vmatprep.subr.bf16.mxu0 %v3501_v0 }
 0x4fc   : > { %2559 = vmatmul.mubr.msk.bf16.vlgmr.msra.gmra.mrb[8].mxu1 %vm792_vm1, %v1673_v41  ;;  %2567 = vmatmul.mubr.msk.bf16.vlgmr.msra.gmra.mrb[12].mxu0 %vm792_vm1, %v1673_v41  ;;  %v2020_v41 = vld [vmem:[%s4089_s20 + $0x8] sm:$0xff] }
 0x4fd   : > { %2574 = vmatprep.mubr.msk.bf16.mxu1 %vm3502_vm0, %v3501_v0  ;;  %2582 = vmatprep.mubr.msk.bf16.mxu0 %vm3502_vm0, %v3501_v0 }
 0x4fe   : > { %2571 = vmatpush3.bf16.msra.mxu1 %v2876_v42  ;;  %2579 = vmatpush3.bf16.msra.mxu0 %v2879_v9 }
 0x4ff   : > { %2572 = vmatprep.subr.bf16.mxu1 %v3501_v0  ;;  %2580 = vmatprep.subr.bf16.mxu0 %v3501_v0 }
 0x502   : > { %2573 = vmatpush3.bf16.msra.mxu1 %v2877_v43  ;;  %2581 = vmatpush3.bf16.msra.mxu0 %v2881_v11 }
 0x503   : > { %2586 = vmatprep.subr.bf16.mxu1 %v3501_v0 }
 0x5cf   : > { %v1728_v45 = vpop.f32.mrb[8].mxu1  ;;  %v1788_v46 = vpop.f32.mrb[12].mxu0 }
 0x5d0   : > { %v2604_v47 = vadd.f32 %v2360_v44, %v1788_v46  ;;  %v2560_v48 = vpop.f32.mrb[9].mxu1  ;;  %v2568_v49 = vpop.f32.mrb[13].mxu0  ;;  %v2602_v58 = vadd.f32 %v2356_v57, %v1728_v45 }
 0x5d1   : > { %v1731_v50 = vpop.f32.mrb[10].mxu1  ;;  %v1791_v51 = vpop.f32.mrb[14].mxu0 }
 0x5d2   : > { %v2376_v52 = vmul.f32 -1.442695, %v2604_v47  ;;  %v2605_v53 = vadd.f32 %v2360_v44, %v1791_v51  ;;  %v2561_v54 = vpop.f32.mrb[11].mxu1  ;;  %v2569_v55 = vpop.f32.mrb[15].mxu0  ;;  %v2603_v60 = vadd.f32 %v2356_v57, %v1731_v50 }
 0x5d4   : > { %2894 = vpow2.f32 %v2376_v52  ;;  %v2377_v56 = vmul.f32 -1.442695, %v2605_v53 }
 0x5d6   : > { %2896 = vpow2.f32 %v2377_v56 }
 0x5d7   : > { %2898 = vtanh.f32 %v2602_v58 }
 0x5de   : > { %v2895_v59 = vpop.eup %2894 }
 0x5df   : > { %v1805_v61 = vadd.f32 1.0, %v2895_v59 }
 0x5e0   : > { %v2897_v62 = vpop.eup %2896 }
 0x5e1   : > { %2900 = vrcp.f32 %v1805_v61  ;;  %v1806_v63 = vadd.f32 1.0, %v2897_v62  ;;  %v2899_v1 = vpop.eup %2898 }
 0x5e2   : > { %2902 = vtanh.f32 %v2603_v60 }
 0x5e3   : > { %2904 = vrcp.f32 %v1806_v63 }
 0x5eb   : > { %v2901_v2 = vpop.eup %2900 }
 0x5ec   : > { %v2903_v3 = vpop.eup %2902  ;;  %v1811_v4 = vmul.f32 %v2901_v2, %v2899_v1 }
 0x5ed   : > { %v2905_v5 = vpop.eup %2904 }
 0x5ee   : > { %v1812_v6 = vmul.f32 %v2905_v5, %v2903_v3 }
 0x5f0   : > { %v1813_v7 = vpack.c.bf16 %v1812_v6, %v1811_v4 }
 0x5f2   : > { %2575 = vmatmul.mubr.msk.bf16.vlgmr.msra.gmra.mrb[4].mxu1 %vm792_vm1, %v1813_v7 }
 0x5f3   : > { %2590 = vmatprep.mubr.msk.bf16.mxu1 %vm3502_vm0, %v3501_v0  ;;  %2587 = vmatpush3.bf16.msra.mxu1 %v2878_v8 }
 0x5f4   : > { %2588 = vmatprep.subr.bf16.mxu1 %v3501_v0  ;;  %v2382_v0 = vld [vmem:[#allocation26] ss:$0 sm:$0xff] }
 0x5f7   : > { %2589 = vmatpush3.bf16.msra.mxu1 %v2880_v10 }
 0x6c5   : > { %v1876_v16 = vpop.f32.mrb[4].mxu1 }
 0x6c6   : > { %v2599_v18 = vadd.f32 %v2598_v15, %v1876_v16  ;;  %v2576_v20 = vpop.f32.mrb[5].mxu1 }
 0x6c7   : > { %v1879_v21 = vpop.f32.mrb[6].mxu1 }
 0x6c8   : > { %v2601_v23 = vadd.f32 %v2598_v15, %v1879_v21  ;;  %v2577_v24 = vpop.f32.mrb[7].mxu1  ;;  %v1885_v25 = vmul.f32 %v2599_v18, %v4151_v13 }
 0x6ca   : > { %v1886_v26 = vmul.f32 %v2601_v23, %v4154_v17 }
 0x6cc   : > { %v1887_v27 = vpack.c.bf16 %v1886_v26, %v1885_v25 }
 0x6ce   : > { %2583 = vmatmul.mubr.msk.bf16.vlgmr.msra.gmra.mrb[16].mxu0 %vm792_vm1, %v1887_v27  ;;  %2591 = vmatmul.mubr.msk.bf16.vlgmr.msra.gmra.mrb[12].mxu1 %vm792_vm1, %v1887_v27 }
 0x7a1   : > { %v1948_v29 = vpop.f32.mrb[16].mxu0  ;;  %v2012_v30 = vpop.f32.mrb[12].mxu1 }
 0x7a2   : > { %v1949_v31 = vadd.f32 %v2382_v0, %v1948_v29  ;;  %v2013_v19 = vadd.f32 %v2386_v28, %v2012_v30  ;;  %v2584_v32 = vpop.f32.mrb[17].mxu0  ;;  %v2592_v22 = vpop.f32.mrb[13].mxu1 }
 0x7a3   : > { %v1951_v33 = vpop.f32.mrb[18].mxu0  ;;  %v2015_v13 = vpop.f32.mrb[14].mxu1 }
 0x7a4   : > { %2390 = vst.msk [vmem:[%s779_s8 + $0x10] sm:$0xff] %vm2029_vm6, %v1949_v31  ;;  %v2021_v17 = vmul.f32 1.442695, %v2013_v19  ;;  %2392 = vst.msk [vmem:[%s779_s8 + $0x20] sm:$0xff] %vm2029_vm6, %v2013_v19  ;;  %v1952_v34 = vadd.f32 %v2382_v0, %v1951_v33  ;;  %v2016_v35 = vadd.f32 %v2386_v28, %v2015_v13  ;;  %v2585_v36 = vpop.f32.mrb[19].mxu0  ;;  %v2593_v37 = vpop.f32.mrb[15].mxu1 }
 0x7a6   : > { %2906 = vpow2.f32 %v2021_v17  ;;  %2391 = vst.msk [vmem:[%s779_s8 + $0x18] sm:$0xff] %vm2029_vm6, %v1952_v34  ;;  %v2023_v38 = vmul.f32 1.442695, %v2016_v35  ;;  %2393 = vst.msk [vmem:[%s779_s8 + $0x28] sm:$0xff] %vm2029_vm6, %v2016_v35 }
 0x7a8   : > { %2908 = vpow2.f32 %v2023_v38 }
 0x7b0   : > { %v2907_v40 = vpop.eup %2906 }
 0x7b1   : > { %v2025_v42 = vmul.f32 %v2907_v40, %v2019_v39 }
 0x7b2   : > { %v2909_v43 = vpop.eup %2908 }
 0x7b3   : > { %v2027_v44 = vadd.f32 %v2025_v42, %v1949_v31  ;;  %v2026_v45 = vmul.f32 %v2909_v43, %v2020_v41 }
 0x7b5   : > { %2030 = vst.msk [vmem:[%s779_s8] sm:$0xff] %vm2029_vm6, %v2027_v44  ;;  %v2028_v46 = vadd.f32 %v2026_v45, %v1952_v34 }
 0x7b7   : > { %2031 = vst.msk [vmem:[%s779_s8 + $0x8] sm:$0xff] %vm2029_vm6, %v2028_v46 }
 0x7b8   : > { %3385 = shalt.err (!%p3382_p3)
}
 0x7b9   : > { %s3386_s23 = scalar_lea.hbm %s4263_s26, 768  ;;  %s3390_s2 = scalar_lea.hbm %s4413_s5, 1536 }
 0x7ba   : > { %p3387_p13 = scmp.ne.s32.totalorder %s4263_s26, %s3386_s23  ;;  %p3391_p11 = scmp.lt.u32.totalorder %s4263_s26, %s4413_s5 }
 0x7bb   : > { %p3392_p5 = scmp.lt.u32.totalorder %s3390_s2, %s3386_s23  ;;  %p3394_p8 = scmp.lt.u32.totalorder %s3386_s23, %s4263_s26 }
 0x7bc   : > { %p3388_p0 = pnand %p3387_p13, %p4414_p10 }
 0x7bd   : > { %p3393_p12 = por %p3392_p5, %p3391_p11 }
 0x7be   : > { %p3389_p1 = pneg %p3388_p0 }
 0x7bf   : > { %p3395_p7 = por %p3394_p8, %p3393_p12 }
 0x7c1   : > { %p3396_p4 = pnand %p3395_p7, %p3389_p1 }
 0x7c3   : > { %3399 = shalt.err (!%p3396_p4)
}
 0x7c4   : > { %s3504_s30 = smov 128   ;;  %s3505_s10 = smov 8  }
 0x7c5   : > { %2704 = dma.vmem_to_hbm [thread:$0]  (%p4414_p10), %s4257_s1, 768, %s4263_s26, %s2039_s22, %s3504_s30, %s3504_s30, %s3505_s10  }
 0x7c6 PF: > { %s4415_s17 = sld [smem:[#allocation44_spill]]  ;;  %p4416_p9 = scmp.ne.s32.totalorder %s4388_s25, 0 }
 0x7c7   : > { %p4417_p6 = scmp.ge.s32.totalorder %s3476_s21, 2 }
 0x7c9   : > { %p2757_p2 = pnand %p4417_p6, %p4416_p9 }
 0x7cc   : > { %s2067_s3 = sand.u32 1, %s4415_s17  }
 0x7cd   : > { %s2068_s24 = scalar_lea.sflag [#allocation7], %s2067_s3 }
 0x7ce   : > { %3459 = dma.done.wait (!%p2757_p2), %s2068_s24, 768  }
 0x7cf   : > { %3461 = vsyncadd (!%p2757_p2), %s2068_s24, 4294966528  ;;  %s4418_s2 = sld [smem:[#allocation45_spill]]  ;;  %s4419_s1 = sld [smem:[#allocation46_spill]] }
 0x7d0   : > { %p44_p3 = scmp.ge.s32.totalorder %s3952_s28, 4   ;;  %s4420_s20 = smov %s3963_s29 }
 0x7d1   : > { %s4421_s21 = smov %s3952_s28 }
 0x7d2   :  { %46 = sbr.rel (!%p44_p3) target bundleno = 34 (0x22), region = 214 }
 0x7d9   :  { %2073 = vsyncpa [#allocation6], 1 }
 0x7da   :  { %2075 = vsyncpa [#allocation6 + $0x1], 1 }
 0x7db   :  { %2076 = vsyncpa [#allocation9], 1 }
 0x7dc   :  { %2078 = vsyncpa [#allocation9 + $0x1], 1 }
 0x7dd   :  { %2079 = vsyncpa [#allocation12], 1 }
 0x7de   :  { %2080 = vsyncpa [#allocation15], 1 }
 0x7df   :  { %2081 = vsyncpa [#allocation18], 1 }
 0x7e0   :  { %2082 = vsyncpa [#allocation21], 1 }
 0x7e1   :  { %2083 = vsyncpa [#allocation24], 1 }
 0x7e2   :  { %2084 = vsyncpa [#allocation27], 1 }
 0x7e3   :  { %2085 = vsyncpa [#allocation30], 1 }
 0x7e4   :  { %2086 = vsyncpa [#allocation7], 1 }
 0x7e5   :  { %2088 = vsyncpa [#allocation7 + $0x1], 1 }

</bundles_post_ra>
